<compile_context>
chip_gen: v6e
topology: v6e:2x2x1
jax: 0.10.0
libtpu: 0.0.40
codegen_flags: <defaults>
</compile_context>

<pallas_src>
import math

import jax
import jax.numpy as jnp
from jax.experimental import pallas as pl
from jax.experimental.pallas import tpu as pltpu


# ----------------------------- kernel ---------------------------------------

def _layernorm(z, w, b, eps=1e-5):
    mu = jnp.mean(z, axis=-1, keepdims=True)
    var = jnp.mean((z - mu) ** 2, axis=-1, keepdims=True)
    return (z - mu) * jax.lax.rsqrt(var + eps) * w + b


def make_fused_kernel(n_head):
    """One transformer Block per grid step; layer axis is grid dim 1."""
    H = n_head

    def kernel(x_ref,
               ln1w, ln1b, wqkv, bqkv, wp, bp, ln2w, ln2b,
               w1, b1, w2, b2, lnfw, lnfb,
               o_ref, x_scr):
        l = pl.program_id(1)
        T, C = x_scr.shape
        hd = C // H

        # Load the batch element's tokens into the resident carry at layer 0.
        @pl.when(l == 0)
        def _():
            x_scr[...] = x_ref[...]

        x = x_scr[...]                                             # (T, C) f32

        # ---------------- attention ----------------------------------------
        xn = _layernorm(x, ln1w[...], ln1b[...])                   # (T, C) f32
        qkv = jnp.dot(xn.astype(jnp.bfloat16), wqkv[...],          # (T, 3C) lane-dense MXU
                      preferred_element_type=jnp.float32) + bqkv[...]
        qkv_b = qkv.astype(jnp.bfloat16)
        # NOTE: 1/sqrt(hd) is pre-folded into the q columns of wqkv/bqkv.

        ys = []
        for h in range(H):                                         # H small: static unroll
            qh = qkv_b[:, h * hd:(h + 1) * hd]                     # (T, hd)
            kh = qkv_b[:, C + h * hd:C + (h + 1) * hd]             # (T, hd)
            vh = qkv_b[:, 2 * C + h * hd:2 * C + (h + 1) * hd]     # (T, hd)
            s = jax.lax.dot_general(qh, kh,                        # q @ k^T -> (T, T)
                                    (((1,), (1,)), ((), ())),
                                    preferred_element_type=jnp.float32)
            s = jnp.exp(s - jnp.max(s, axis=-1, keepdims=True))    # in-place style: one buffer
            s = s * pl.reciprocal(jnp.sum(s, axis=-1, keepdims=True), approx=True)
            ys.append(jnp.dot(s.astype(jnp.bfloat16), vh,          # (T, hd)
                              preferred_element_type=jnp.float32))
        y = jnp.concatenate(ys, axis=-1)                           # merge heads -> (T, C)
        x = x + jnp.dot(y.astype(jnp.bfloat16), wp[...],           # lane-dense (C, C) proj
                        preferred_element_type=jnp.float32) + bp[...]

        # ---------------- MLP -----------------------------------------------
        xn2 = _layernorm(x, ln2w[...], ln2b[...])
        hmid = jnp.dot(xn2.astype(jnp.bfloat16), w1[...],
                       preferred_element_type=jnp.float32) + b1[...]
        hmid = jnp.maximum(hmid, 0.0)                              # ReLU
        x = x + jnp.dot(hmid.astype(jnp.bfloat16), w2[...],
                        preferred_element_type=jnp.float32) + b2[...]

        x_scr[...] = x                                             # carry to next layer

        # Final LayerNorm + writeback only at the last layer.
        @pl.when(l == pl.num_programs(1) - 1)
        def _():
            o_ref[...] = _layernorm(x, lnfw[...], lnfb[...])

    return kernel


# ----------------------------- pallas wrapper --------------------------------

def run_transformer(x, packed, n_head):
    """grid = (B, n_layer): batch-parallel, layer axis sequential with the
    activation carried in VMEM scratch and per-layer weights streamed."""
    B, T, C = x.shape
    L = packed["wqkv"].shape[0]
    Ch = packed["w1"].shape[-1]

    def lspec(per_layer_shape):
        nd = len(per_layer_shape)

        def idx(b, l):
            return (l,) + (0,) * nd

        return pl.BlockSpec((pl.Squeezed(),) + per_layer_shape, idx)

    def full_spec(shape):
        nd = len(shape)

        def idx(b, l):
            return (0,) * nd

        return pl.BlockSpec(shape, idx)

    def x_idx(b, l):
        return (b, 0, 0)

    x_spec = pl.BlockSpec((pl.Squeezed(), T, C), x_idx)

    names = ("ln1_w", "ln1_b", "wqkv", "bqkv", "wp", "bp", "ln2_w", "ln2_b",
             "w1", "b1", "w2", "b2", "lnf_w", "lnf_b")
    weights = [packed[n] for n in names]
    in_specs = [x_spec]
    for n, w in zip(names, weights):
        if n.startswith("lnf"):
            in_specs.append(full_spec(w.shape))        # tiny, stays resident
        else:
            in_specs.append(lspec(w.shape[1:]))        # streamed per layer

    return pl.pallas_call(
        make_fused_kernel(n_head),
        out_shape=jax.ShapeDtypeStruct((B, T, C), jnp.float32),
        grid_spec=pltpu.PrefetchScalarGridSpec(
            num_scalar_prefetch=0,
            grid=(B, L),
            in_specs=in_specs,
            out_specs=x_spec,
            scratch_shapes=[pltpu.VMEM((T, C), jnp.float32)]),
        compiler_params=pltpu.CompilerParams(
            dimension_semantics=("parallel", "arbitrary"),
            vmem_limit_bytes=56 * 1024 * 1024),
    )(x, *weights)


# ----------------------------- params ----------------------------------------

def init_params(key, n_embd, block_exp, n_layer):
    """Matches _init_weights: Linear W ~ N(0, 0.02), b = 0; LayerNorm w=1, b=0.
    Linear weights stored (in, out) for y = x @ W + b."""
    C, Ch = n_embd, block_exp * n_embd
    lin = lambda k, din, dout: 0.02 * jax.random.normal(k, (din, dout), jnp.float32)
    layers = []
    for l in range(n_layer):
        ks = jax.random.split(jax.random.fold_in(key, l), 6)
        layers.append(dict(
            ln1_w=jnp.ones((C,), jnp.float32), ln1_b=jnp.zeros((C,), jnp.float32),
            wq=lin(ks[0], C, C), bq=jnp.zeros((C,), jnp.float32),
            wk=lin(ks[1], C, C), bk=jnp.zeros((C,), jnp.float32),
            wv=lin(ks[2], C, C), bv=jnp.zeros((C,), jnp.float32),
            wp=lin(ks[3], C, C), bp=jnp.zeros((C,), jnp.float32),
            ln2_w=jnp.ones((C,), jnp.float32), ln2_b=jnp.zeros((C,), jnp.float32),
            w1=lin(ks[4], C, Ch), b1=jnp.zeros((Ch,), jnp.float32),
            w2=lin(ks[5], Ch, C), b2=jnp.zeros((C,), jnp.float32),
        ))
    lnf_w = jnp.ones((C,), jnp.float32)
    lnf_b = jnp.zeros((C,), jnp.float32)
    return layers, lnf_w, lnf_b


def pack_for_kernel(layers, lnf_w, lnf_b, n_head):
    """Stack per-layer weights, lane-dense layouts only:
      wqkv: (L, C, 3C) bf16   bqkv: (L, 1, 3C) f32   (q|k|v along out-features)
      wp  : (L, C, C)  bf16   w1: (L, C, Ch) bf16    w2: (L, Ch, C) bf16
    1/sqrt(head_dim) is folded into the q columns (one-time, wrapper side)."""
    L = len(layers)
    C = layers[0]["wq"].shape[0]
    hd = C // n_head
    scale = 1.0 / math.sqrt(hd)

    st = lambda name: jnp.stack([p[name] for p in layers])       # (L, ...)
    row = lambda name: st(name)[:, None, :]                      # (L, 1, X)
    bf = lambda a: a.astype(jnp.bfloat16)

    wqkv = jnp.concatenate([st("wq") * scale, st("wk"), st("wv")], axis=-1)   # (L, C, 3C)
    bqkv = jnp.concatenate([st("bq") * scale, st("bk"), st("bv")],
                           axis=-1)[:, None, :]                               # (L, 1, 3C)

    return dict(
        ln1_w=row("ln1_w"), ln1_b=row("ln1_b"),
        wqkv=bf(wqkv), bqkv=bqkv,
        wp=bf(st("wp")), bp=row("bp"),
        ln2_w=row("ln2_w"), ln2_b=row("ln2_b"),
        w1=bf(st("w1")), b1=row("b1"),
        w2=bf(st("w2")), b2=row("b2"),
        lnf_w=lnf_w.reshape(1, C), lnf_b=lnf_b.reshape(1, C),
    )


# ----------------------------- forward (module semantics) --------------------

def transfuse_forward(m1, m2, packed, pos_emb, seq_len, n_embd, n_head,
                      num_anchors):
    bz = m2.shape[0] // seq_len
    h, w = m2.shape[2], m2.shape[3]
    C = n_embd
    # NCHW -> token embeddings (matches torch view/permute)
    m1r = m1.reshape(bz, seq_len, -1, h, w)
    m2r = m2.reshape(bz, seq_len, -1, h, w)
    tok = jnp.concatenate([m1r, m2r], axis=1)                    # (bz, 2S, C, h, w)
    tok = jnp.transpose(tok, (0, 1, 3, 4, 2)).reshape(bz, -1, C)
    x = pos_emb + tok                                            # drop = identity (eval)
    x = run_transformer(x, packed, n_head)                       # fused blocks + ln_f
    # tokens -> NCHW, split modalities
    x = x.reshape(bz, 2 * seq_len, num_anchors, num_anchors, C)
    x = jnp.transpose(x, (0, 1, 4, 2, 3))
    m1_out = x[:, :seq_len].reshape(bz * seq_len, -1, h, w)
    m2_out = x[:, seq_len:].reshape(bz * seq_len, -1, h, w)
    # TODO(synk): PyTorch forward print()s m1_out/m2_out extrema; omitted to keep stdout clean.
    return m1_out, m2_out


# ----------------------------- pure-JAX reference ----------------------------

def block_ref(x, p, n_head):
    def ln(z, w, b):
        mu = z.mean(-1, keepdims=True)
        var = ((z - mu) ** 2).mean(-1, keepdims=True)
        return (z - mu) / jnp.sqrt(var + 1e-5) * w + b
    B, T, C = x.shape
    hd = C // n_head
    xn = ln(x, p["ln1_w"], p["ln1_b"])
    q = (xn @ p["wq"] + p["bq"]).reshape(B, T, n_head, hd).transpose(0, 2, 1, 3)
    k = (xn @ p["wk"] + p["bk"]).reshape(B, T, n_head, hd).transpose(0, 2, 1, 3)
    v = (xn @ p["wv"] + p["bv"]).reshape(B, T, n_head, hd).transpose(0, 2, 1, 3)
    att = jax.nn.softmax((q @ k.transpose(0, 1, 3, 2)) / math.sqrt(hd), axis=-1)
    y = (att @ v).transpose(0, 2, 1, 3).reshape(B, T, C)
    x = x + (y @ p["wp"] + p["bp"])
    xn2 = ln(x, p["ln2_w"], p["ln2_b"])
    return x + (jnp.maximum(xn2 @ p["w1"] + p["b1"], 0.0) @ p["w2"] + p["b2"])


# ----------------------------- main -------------------------------------------

if __name__ == "__main__":
    # Small config consistent with the module's forward.
    n_embd, n_head, block_exp, n_layer = 32, 4, 4, 2
    num_anchors, seq_len, bz = 4, 1, 2
    h = w = num_anchors
    T = 2 * seq_len * num_anchors * num_anchors

    key = jax.random.PRNGKey(0)
    k_m1, k_m2, k_par = jax.random.split(key, 3)
    m1 = jax.random.normal(k_m1, (bz * seq_len, n_embd, h, w), jnp.float32)
    m2 = jax.random.normal(k_m2, (bz * seq_len, n_embd, h, w), jnp.float32)

    layers, lnf_w, lnf_b = init_params(k_par, n_embd, block_exp, n_layer)
    packed = pack_for_kernel(layers, lnf_w, lnf_b, n_head)
    pos_emb = jnp.zeros((1, T, n_embd), jnp.float32)   # nn.Parameter(torch.zeros(...))

    m1_out, m2_out = transfuse_forward(m1, m2, packed, pos_emb,
                                       seq_len, n_embd, n_head, num_anchors)
    jax.block_until_ready((m1_out, m2_out))

    assert m1_out.shape == (bz * seq_len, n_embd, h, w)
    assert m2_out.shape == (bz * seq_len, n_embd, h, w)

    # Cross-check the fused Pallas kernel against a pure-JAX fp32 reference.
    with jax.default_matmul_precision("highest"):
        tok = jnp.concatenate([m1.reshape(bz, seq_len, -1, h, w),
                               m2.reshape(bz, seq_len, -1, h, w)], axis=1)
        tok = jnp.transpose(tok, (0, 1, 3, 4, 2)).reshape(bz, -1, n_embd)
        xr = pos_emb + tok
        for p in layers:
            xr = block_ref(xr, p, n_head)
        mu = xr.mean(-1, keepdims=True)
        var = ((xr - mu) ** 2).mean(-1, keepdims=True)
        xr = (xr - mu) / jnp.sqrt(var + 1e-5) * lnf_w + lnf_b
        xr = xr.reshape(bz, 2 * seq_len, num_anchors, num_anchors, n_embd)
        xr = jnp.transpose(xr, (0, 1, 4, 2, 3))
        m1_ref = xr[:, :seq_len].reshape(bz * seq_len, -1, h, w)
        m2_ref = xr[:, seq_len:].reshape(bz * seq_len, -1, h, w)

    assert jnp.allclose(m1_out, m1_ref, rtol=2e-2, atol=2e-2)
    assert jnp.allclose(m2_out, m2_ref, rtol=2e-2, atol=2e-2)

    print("KERNEL_OK")
</pallas_src>

<mosaic_0001>
module attributes {stable_mosaic.version = 11 : i64} {
  func.func @kernel(%arg0: i32, %arg1: i32, %arg2: memref<1x32x32xf32, #tpu.memory_space<vmem>>, %arg3: memref<1x1x32xf32, #tpu.memory_space<vmem>>, %arg4: memref<1x1x32xf32, #tpu.memory_space<vmem>>, %arg5: memref<1x32x96xbf16, #tpu.memory_space<vmem>>, %arg6: memref<1x1x96xf32, #tpu.memory_space<vmem>>, %arg7: memref<1x32x32xbf16, #tpu.memory_space<vmem>>, %arg8: memref<1x1x32xf32, #tpu.memory_space<vmem>>, %arg9: memref<1x1x32xf32, #tpu.memory_space<vmem>>, %arg10: memref<1x1x32xf32, #tpu.memory_space<vmem>>, %arg11: memref<1x32x128xbf16, #tpu.memory_space<vmem>>, %arg12: memref<1x1x128xf32, #tpu.memory_space<vmem>>, %arg13: memref<1x128x32xbf16, #tpu.memory_space<vmem>>, %arg14: memref<1x1x32xf32, #tpu.memory_space<vmem>>, %arg15: memref<1x32xf32, #tpu.memory_space<vmem>>, %arg16: memref<1x32xf32, #tpu.memory_space<vmem>>, %arg17: memref<1x32x32xf32, #tpu.memory_space<vmem>>, %arg18: memref<32x32xf32, #tpu.memory_space<vmem>>) attributes {dimension_semantics = [#tpu.dimension_semantics<parallel>, #tpu.dimension_semantics<arbitrary>], iteration_bounds = array<i64: 2, 2>, scalar_prefetch = 0 : i64, scratch_operands = 1 : i64, tpu.core_type = #tpu.core_type<tc>, window_params = [{transform_indices = @transform_0, window_bounds = array<i64: 1, 32, 32>}, {transform_indices = @transform_1, window_bounds = array<i64: 1, 1, 32>}, {transform_indices = @transform_2, window_bounds = array<i64: 1, 1, 32>}, {transform_indices = @transform_3, window_bounds = array<i64: 1, 32, 96>}, {transform_indices = @transform_4, window_bounds = array<i64: 1, 1, 96>}, {transform_indices = @transform_5, window_bounds = array<i64: 1, 32, 32>}, {transform_indices = @transform_6, window_bounds = array<i64: 1, 1, 32>}, {transform_indices = @transform_7, window_bounds = array<i64: 1, 1, 32>}, {transform_indices = @transform_8, window_bounds = array<i64: 1, 1, 32>}, {transform_indices = @transform_9, window_bounds = array<i64: 1, 32, 128>}, {transform_indices = @transform_10, window_bounds = array<i64: 1, 1, 128>}, {transform_indices = @transform_11, window_bounds = array<i64: 1, 128, 32>}, {transform_indices = @transform_12, window_bounds = array<i64: 1, 1, 32>}, {pipeline_mode = #tpu.pipeline_mode<synchronous>, transform_indices = @transform_13, window_bounds = array<i64: 1, 32>}, {pipeline_mode = #tpu.pipeline_mode<synchronous>, transform_indices = @transform_14, window_bounds = array<i64: 1, 32>}, {transform_indices = @transform_15, window_bounds = array<i64: 1, 32, 32>}]} {
    %c0_i32 = arith.constant 0 : i32
    %0 = arith.cmpi eq, %arg1, %c0_i32 : i32
    %1 = arith.extui %0 : i1 to i32
    %c0_i32_0 = arith.constant 0 : i32
    %2 = arith.cmpi ne, %1, %c0_i32_0 : i32
    scf.if %2 {
      %c0_71 = arith.constant 0 : index
      %c0_72 = arith.constant 0 : index
      %c0_73 = arith.constant 0 : index
      %162 = vector.load %arg2[%c0_71, %c0_72, %c0_73] : memref<1x32x32xf32, #tpu.memory_space<vmem>>, vector<1x32x32xf32>
      %163 = vector.shape_cast %162 : vector<1x32x32xf32> to vector<32x32xf32>
      %c0_74 = arith.constant 0 : index
      %c0_75 = arith.constant 0 : index
      %164 = vector.load %arg18[%c0_74, %c0_75] : memref<32x32xf32, #tpu.memory_space<vmem>>, vector<32x32xf32>
      tpu.vector_store %arg18[%c0_74, %c0_75], %163 {strides = array<i32>} : memref<32x32xf32, #tpu.memory_space<vmem>>, vector<32x32xf32>,
    } else {
    }
    %c0 = arith.constant 0 : index
    %c0_1 = arith.constant 0 : index
    %3 = vector.load %arg18[%c0, %c0_1] : memref<32x32xf32, #tpu.memory_space<vmem>>, vector<32x32xf32>
    %c0_2 = arith.constant 0 : index
    %c0_3 = arith.constant 0 : index
    %c0_4 = arith.constant 0 : index
    %4 = vector.load %arg3[%c0_2, %c0_3, %c0_4] : memref<1x1x32xf32, #tpu.memory_space<vmem>>, vector<1x1x32xf32>
    %5 = vector.shape_cast %4 : vector<1x1x32xf32> to vector<1x32xf32>
    %c0_5 = arith.constant 0 : index
    %c0_6 = arith.constant 0 : index
    %c0_7 = arith.constant 0 : index
    %6 = vector.load %arg4[%c0_5, %c0_6, %c0_7] : memref<1x1x32xf32, #tpu.memory_space<vmem>>, vector<1x1x32xf32>
    %7 = vector.shape_cast %6 : vector<1x1x32xf32> to vector<1x32xf32>
    %cst = arith.constant dense<0.000000e+00> : vector<32xf32>
    %8 = vector.multi_reduction <add>, %3, %cst [1] : vector<32x32xf32> to vector<32xf32>
    %9 = vector.shape_cast %8 : vector<32xf32> to vector<32x1xf32>
    %cst_8 = arith.constant 3.200000e+01 : f32
    %10 = vector.broadcast %cst_8 : f32 to vector<32x1xf32>
    %11 = arith.divf %9, %10 : vector<32x1xf32>
    %12 = vector.broadcast %11 : vector<32x1xf32> to vector<32x32xf32>
    %13 = arith.subf %3, %12 : vector<32x32xf32>
    %14 = arith.mulf %13, %13 : vector<32x32xf32>
    %cst_9 = arith.constant dense<0.000000e+00> : vector<32xf32>
    %15 = vector.multi_reduction <add>, %14, %cst_9 [1] : vector<32x32xf32> to vector<32xf32>
    %16 = vector.shape_cast %15 : vector<32xf32> to vector<32x1xf32>
    %cst_10 = arith.constant 3.200000e+01 : f32
    %17 = vector.broadcast %cst_10 : f32 to vector<32x1xf32>
    %18 = arith.divf %16, %17 : vector<32x1xf32>
    %19 = vector.broadcast %11 : vector<32x1xf32> to vector<32x32xf32>
    %20 = arith.subf %3, %19 : vector<32x32xf32>
    %cst_11 = arith.constant 9.99999974E-6 : f32
    %21 = vector.broadcast %cst_11 : f32 to vector<32x1xf32>
    %22 = arith.addf %18, %21 : vector<32x1xf32>
    %23 = math.rsqrt %22 : vector<32x1xf32>
    %24 = vector.broadcast %23 : vector<32x1xf32> to vector<32x32xf32>
    %25 = arith.mulf %20, %24 : vector<32x32xf32>
    %26 = vector.broadcast %5 : vector<1x32xf32> to vector<32x32xf32>
    %27 = arith.mulf %25, %26 : vector<32x32xf32>
    %28 = vector.broadcast %7 : vector<1x32xf32> to vector<32x32xf32>
    %29 = arith.addf %27, %28 : vector<32x32xf32>
    %30 = arith.truncf %29 : vector<32x32xf32> to vector<32x32xbf16>
    %c0_12 = arith.constant 0 : index
    %c0_13 = arith.constant 0 : index
    %c0_14 = arith.constant 0 : index
    %31 = vector.load %arg5[%c0_12, %c0_13, %c0_14] : memref<1x32x96xbf16, #tpu.memory_space<vmem>>, vector<1x32x96xbf16>
    %32 = vector.shape_cast %31 : vector<1x32x96xbf16> to vector<32x96xbf16>
    %cst_15 = arith.constant dense<0.000000e+00> : vector<32x96xf32>
    %33 = tpu.matmul %30, %32, %cst_15 {dimension_numbers = #tpu.dot_dimension_numbers<[1], [0], [0], [1], [0, 0, 1, 1], [], []>} : vector<32x32xbf16>, vector<32x96xbf16>, vector<32x96xf32> -> vector<32x96xf32>
    %c0_16 = arith.constant 0 : index
    %c0_17 = arith.constant 0 : index
    %c0_18 = arith.constant 0 : index
    %34 = vector.load %arg6[%c0_16, %c0_17, %c0_18] : memref<1x1x96xf32, #tpu.memory_space<vmem>>, vector<1x1x96xf32>
    %35 = vector.shape_cast %34 : vector<1x1x96xf32> to vector<1x96xf32>
    %36 = vector.broadcast %35 : vector<1x96xf32> to vector<32x96xf32>
    %37 = arith.addf %33, %36 : vector<32x96xf32>
    %38 = arith.truncf %37 : vector<32x96xf32> to vector<32x96xbf16>
    %39 = vector.extract_strided_slice %38 {offsets = [0, 0], sizes = [32, 8], strides = [1, 1]} : vector<32x96xbf16> to vector<32x8xbf16>
    %40 = vector.extract_strided_slice %38 {offsets = [0, 32], sizes = [32, 8], strides = [1, 1]} : vector<32x96xbf16> to vector<32x8xbf16>
    %41 = vector.extract_strided_slice %38 {offsets = [0, 64], sizes = [32, 8], strides = [1, 1]} : vector<32x96xbf16> to vector<32x8xbf16>
    %cst_19 = arith.constant dense<0.000000e+00> : vector<32x32xf32>
    %42 = tpu.matmul %39, %40, %cst_19 {dimension_numbers = #tpu.dot_dimension_numbers<[1], [1], [0], [0], [0, 0, 1, 0], [], []>} : vector<32x8xbf16>, vector<32x8xbf16>, vector<32x32xf32> -> vector<32x32xf32>
    %cst_20 = arith.constant dense<0xFF800000> : vector<32xf32>
    %43 = vector.multi_reduction <maximumf>, %42, %cst_20 [1] : vector<32x32xf32> to vector<32xf32>
    %44 = vector.shape_cast %43 : vector<32xf32> to vector<32x1xf32>
    %45 = vector.broadcast %44 : vector<32x1xf32> to vector<32x32xf32>
    %46 = arith.subf %42, %45 : vector<32x32xf32>
    %47 = math.exp %46 : vector<32x32xf32>
    %cst_21 = arith.constant dense<0.000000e+00> : vector<32xf32>
    %48 = vector.multi_reduction <add>, %47, %cst_21 [1] : vector<32x32xf32> to vector<32xf32>
    %49 = vector.shape_cast %48 : vector<32xf32> to vector<32x1xf32>
    %50 = tpu.reciprocal %49 {approx = true} : vector<32x1xf32> -> vector<32x1xf32>
    %51 = vector.broadcast %50 : vector<32x1xf32> to vector<32x32xf32>
    %52 = arith.mulf %47, %51 : vector<32x32xf32>
    %53 = arith.truncf %52 : vector<32x32xf32> to vector<32x32xbf16>
    %cst_22 = arith.constant dense<0.000000e+00> : vector<32x8xf32>
    %54 = tpu.matmul %53, %41, %cst_22 {dimension_numbers = #tpu.dot_dimension_numbers<[1], [0], [0], [1], [0, 0, 1, 1], [], []>} : vector<32x32xbf16>, vector<32x8xbf16>, vector<32x8xf32> -> vector<32x8xf32>
    %55 = vector.extract_strided_slice %38 {offsets = [0, 8], sizes = [32, 8], strides = [1, 1]} : vector<32x96xbf16> to vector<32x8xbf16>
    %56 = vector.extract_strided_slice %38 {offsets = [0, 40], sizes = [32, 8], strides = [1, 1]} : vector<32x96xbf16> to vector<32x8xbf16>
    %57 = vector.extract_strided_slice %38 {offsets = [0, 72], sizes = [32, 8], strides = [1, 1]} : vector<32x96xbf16> to vector<32x8xbf16>
    %cst_23 = arith.constant dense<0.000000e+00> : vector<32x32xf32>
    %58 = tpu.matmul %55, %56, %cst_23 {dimension_numbers = #tpu.dot_dimension_numbers<[1], [1], [0], [0], [0, 0, 1, 0], [], []>} : vector<32x8xbf16>, vector<32x8xbf16>, vector<32x32xf32> -> vector<32x32xf32>
    %cst_24 = arith.constant dense<0xFF800000> : vector<32xf32>
    %59 = vector.multi_reduction <maximumf>, %58, %cst_24 [1] : vector<32x32xf32> to vector<32xf32>
    %60 = vector.shape_cast %59 : vector<32xf32> to vector<32x1xf32>
    %61 = vector.broadcast %60 : vector<32x1xf32> to vector<32x32xf32>
    %62 = arith.subf %58, %61 : vector<32x32xf32>
    %63 = math.exp %62 : vector<32x32xf32>
    %cst_25 = arith.constant dense<0.000000e+00> : vector<32xf32>
    %64 = vector.multi_reduction <add>, %63, %cst_25 [1] : vector<32x32xf32> to vector<32xf32>
    %65 = vector.shape_cast %64 : vector<32xf32> to vector<32x1xf32>
    %66 = tpu.reciprocal %65 {approx = true} : vector<32x1xf32> -> vector<32x1xf32>
    %67 = vector.broadcast %66 : vector<32x1xf32> to vector<32x32xf32>
    %68 = arith.mulf %63, %67 : vector<32x32xf32>
    %69 = arith.truncf %68 : vector<32x32xf32> to vector<32x32xbf16>
    %cst_26 = arith.constant dense<0.000000e+00> : vector<32x8xf32>
    %70 = tpu.matmul %69, %57, %cst_26 {dimension_numbers = #tpu.dot_dimension_numbers<[1], [0], [0], [1], [0, 0, 1, 1], [], []>} : vector<32x32xbf16>, vector<32x8xbf16>, vector<32x8xf32> -> vector<32x8xf32>
    %71 = vector.extract_strided_slice %38 {offsets = [0, 16], sizes = [32, 8], strides = [1, 1]} : vector<32x96xbf16> to vector<32x8xbf16>
    %72 = vector.extract_strided_slice %38 {offsets = [0, 48], sizes = [32, 8], strides = [1, 1]} : vector<32x96xbf16> to vector<32x8xbf16>
    %73 = vector.extract_strided_slice %38 {offsets = [0, 80], sizes = [32, 8], strides = [1, 1]} : vector<32x96xbf16> to vector<32x8xbf16>
    %cst_27 = arith.constant dense<0.000000e+00> : vector<32x32xf32>
    %74 = tpu.matmul %71, %72, %cst_27 {dimension_numbers = #tpu.dot_dimension_numbers<[1], [1], [0], [0], [0, 0, 1, 0], [], []>} : vector<32x8xbf16>, vector<32x8xbf16>, vector<32x32xf32> -> vector<32x32xf32>
    %cst_28 = arith.constant dense<0xFF800000> : vector<32xf32>
    %75 = vector.multi_reduction <maximumf>, %74, %cst_28 [1] : vector<32x32xf32> to vector<32xf32>
    %76 = vector.shape_cast %75 : vector<32xf32> to vector<32x1xf32>
    %77 = vector.broadcast %76 : vector<32x1xf32> to vector<32x32xf32>
    %78 = arith.subf %74, %77 : vector<32x32xf32>
    %79 = math.exp %78 : vector<32x32xf32>
    %cst_29 = arith.constant dense<0.000000e+00> : vector<32xf32>
    %80 = vector.multi_reduction <add>, %79, %cst_29 [1] : vector<32x32xf32> to vector<32xf32>
    %81 = vector.shape_cast %80 : vector<32xf32> to vector<32x1xf32>
    %82 = tpu.reciprocal %81 {approx = true} : vector<32x1xf32> -> vector<32x1xf32>
    %83 = vector.broadcast %82 : vector<32x1xf32> to vector<32x32xf32>
    %84 = arith.mulf %79, %83 : vector<32x32xf32>
    %85 = arith.truncf %84 : vector<32x32xf32> to vector<32x32xbf16>
    %cst_30 = arith.constant dense<0.000000e+00> : vector<32x8xf32>
    %86 = tpu.matmul %85, %73, %cst_30 {dimension_numbers = #tpu.dot_dimension_numbers<[1], [0], [0], [1], [0, 0, 1, 1], [], []>} : vector<32x32xbf16>, vector<32x8xbf16>, vector<32x8xf32> -> vector<32x8xf32>
    %87 = vector.extract_strided_slice %38 {offsets = [0, 24], sizes = [32, 8], strides = [1, 1]} : vector<32x96xbf16> to vector<32x8xbf16>
    %88 = vector.extract_strided_slice %38 {offsets = [0, 56], sizes = [32, 8], strides = [1, 1]} : vector<32x96xbf16> to vector<32x8xbf16>
    %89 = vector.extract_strided_slice %38 {offsets = [0, 88], sizes = [32, 8], strides = [1, 1]} : vector<32x96xbf16> to vector<32x8xbf16>
    %cst_31 = arith.constant dense<0.000000e+00> : vector<32x32xf32>
    %90 = tpu.matmul %87, %88, %cst_31 {dimension_numbers = #tpu.dot_dimension_numbers<[1], [1], [0], [0], [0, 0, 1, 0], [], []>} : vector<32x8xbf16>, vector<32x8xbf16>, vector<32x32xf32> -> vector<32x32xf32>
    %cst_32 = arith.constant dense<0xFF800000> : vector<32xf32>
    %91 = vector.multi_reduction <maximumf>, %90, %cst_32 [1] : vector<32x32xf32> to vector<32xf32>
    %92 = vector.shape_cast %91 : vector<32xf32> to vector<32x1xf32>
    %93 = vector.broadcast %92 : vector<32x1xf32> to vector<32x32xf32>
    %94 = arith.subf %90, %93 : vector<32x32xf32>
    %95 = math.exp %94 : vector<32x32xf32>
    %cst_33 = arith.constant dense<0.000000e+00> : vector<32xf32>
    %96 = vector.multi_reduction <add>, %95, %cst_33 [1] : vector<32x32xf32> to vector<32xf32>
    %97 = vector.shape_cast %96 : vector<32xf32> to vector<32x1xf32>
    %98 = tpu.reciprocal %97 {approx = true} : vector<32x1xf32> -> vector<32x1xf32>
    %99 = vector.broadcast %98 : vector<32x1xf32> to vector<32x32xf32>
    %100 = arith.mulf %95, %99 : vector<32x32xf32>
    %101 = arith.truncf %100 : vector<32x32xf32> to vector<32x32xbf16>
    %cst_34 = arith.constant dense<0.000000e+00> : vector<32x8xf32>
    %102 = tpu.matmul %101, %89, %cst_34 {dimension_numbers = #tpu.dot_dimension_numbers<[1], [0], [0], [1], [0, 0, 1, 1], [], []>} : vector<32x32xbf16>, vector<32x8xbf16>, vector<32x8xf32> -> vector<32x8xf32>
    %103 = tpu.concatenate %54, %70, %86, %102 in 1 : vector<32x8xf32>, vector<32x8xf32>, vector<32x8xf32>, vector<32x8xf32> -> vector<32x32xf32>
    %104 = arith.truncf %103 : vector<32x32xf32> to vector<32x32xbf16>
    %c0_35 = arith.constant 0 : index
    %c0_36 = arith.constant 0 : index
    %c0_37 = arith.constant 0 : index
    %105 = vector.load %arg7[%c0_35, %c0_36, %c0_37] : memref<1x32x32xbf16, #tpu.memory_space<vmem>>, vector<1x32x32xbf16>
    %106 = vector.shape_cast %105 : vector<1x32x32xbf16> to vector<32x32xbf16>
    %cst_38 = arith.constant dense<0.000000e+00> : vector<32x32xf32>
    %107 = tpu.matmul %104, %106, %cst_38 {dimension_numbers = #tpu.dot_dimension_numbers<[1], [0], [0], [1], [0, 0, 1, 1], [], []>} : vector<32x32xbf16>, vector<32x32xbf16>, vector<32x32xf32> -> vector<32x32xf32>
    %108 = arith.addf %3, %107 : vector<32x32xf32>
    %c0_39 = arith.constant 0 : index
    %c0_40 = arith.constant 0 : index
    %c0_41 = arith.constant 0 : index
    %109 = vector.load %arg8[%c0_39, %c0_40, %c0_41] : memref<1x1x32xf32, #tpu.memory_space<vmem>>, vector<1x1x32xf32>
    %110 = vector.shape_cast %109 : vector<1x1x32xf32> to vector<1x32xf32>
    %111 = vector.broadcast %110 : vector<1x32xf32> to vector<32x32xf32>
    %112 = arith.addf %108, %111 : vector<32x32xf32>
    %c0_42 = arith.constant 0 : index
    %c0_43 = arith.constant 0 : index
    %c0_44 = arith.constant 0 : index
    %113 = vector.load %arg9[%c0_42, %c0_43, %c0_44] : memref<1x1x32xf32, #tpu.memory_space<vmem>>, vector<1x1x32xf32>
    %114 = vector.shape_cast %113 : vector<1x1x32xf32> to vector<1x32xf32>
    %c0_45 = arith.constant 0 : index
    %c0_46 = arith.constant 0 : index
    %c0_47 = arith.constant 0 : index
    %115 = vector.load %arg10[%c0_45, %c0_46, %c0_47] : memref<1x1x32xf32, #tpu.memory_space<vmem>>, vector<1x1x32xf32>
    %116 = vector.shape_cast %115 : vector<1x1x32xf32> to vector<1x32xf32>
    %cst_48 = arith.constant dense<0.000000e+00> : vector<32xf32>
    %117 = vector.multi_reduction <add>, %112, %cst_48 [1] : vector<32x32xf32> to vector<32xf32>
    %118 = vector.shape_cast %117 : vector<32xf32> to vector<32x1xf32>
    %cst_49 = arith.constant 3.200000e+01 : f32
    %119 = vector.broadcast %cst_49 : f32 to vector<32x1xf32>
    %120 = arith.divf %118, %119 : vector<32x1xf32>
    %121 = vector.broadcast %120 : vector<32x1xf32> to vector<32x32xf32>
    %122 = arith.subf %112, %121 : vector<32x32xf32>
    %123 = arith.mulf %122, %122 : vector<32x32xf32>
    %cst_50 = arith.constant dense<0.000000e+00> : vector<32xf32>
    %124 = vector.multi_reduction <add>, %123, %cst_50 [1] : vector<32x32xf32> to vector<32xf32>
    %125 = vector.shape_cast %124 : vector<32xf32> to vector<32x1xf32>
    %cst_51 = arith.constant 3.200000e+01 : f32
    %126 = vector.broadcast %cst_51 : f32 to vector<32x1xf32>
    %127 = arith.divf %125, %126 : vector<32x1xf32>
    %128 = vector.broadcast %120 : vector<32x1xf32> to vector<32x32xf32>
    %129 = arith.subf %112, %128 : vector<32x32xf32>
    %cst_52 = arith.constant 9.99999974E-6 : f32
    %130 = vector.broadcast %cst_52 : f32 to vector<32x1xf32>
    %131 = arith.addf %127, %130 : vector<32x1xf32>
    %132 = math.rsqrt %131 : vector<32x1xf32>
    %133 = vector.broadcast %132 : vector<32x1xf32> to vector<32x32xf32>
    %134 = arith.mulf %129, %133 : vector<32x32xf32>
    %135 = vector.broadcast %114 : vector<1x32xf32> to vector<32x32xf32>
    %136 = arith.mulf %134, %135 : vector<32x32xf32>
    %137 = vector.broadcast %116 : vector<1x32xf32> to vector<32x32xf32>
    %138 = arith.addf %136, %137 : vector<32x32xf32>
    %139 = arith.truncf %138 : vector<32x32xf32> to vector<32x32xbf16>
    %c0_53 = arith.constant 0 : index
    %c0_54 = arith.constant 0 : index
    %c0_55 = arith.constant 0 : index
    %140 = vector.load %arg11[%c0_53, %c0_54, %c0_55] : memref<1x32x128xbf16, #tpu.memory_space<vmem>>, vector<1x32x128xbf16>
    %141 = vector.shape_cast %140 : vector<1x32x128xbf16> to vector<32x128xbf16>
    %cst_56 = arith.constant dense<0.000000e+00> : vector<32x128xf32>
    %142 = tpu.matmul %139, %141, %cst_56 {dimension_numbers = #tpu.dot_dimension_numbers<[1], [0], [0], [1], [0, 0, 1, 1], [], []>} : vector<32x32xbf16>, vector<32x128xbf16>, vector<32x128xf32> -> vector<32x128xf32>
    %c0_57 = arith.constant 0 : index
    %c0_58 = arith.constant 0 : index
    %c0_59 = arith.constant 0 : index
    %143 = vector.load %arg12[%c0_57, %c0_58, %c0_59] : memref<1x1x128xf32, #tpu.memory_space<vmem>>, vector<1x1x128xf32>
    %144 = vector.shape_cast %143 : vector<1x1x128xf32> to vector<1x128xf32>
    %145 = vector.broadcast %144 : vector<1x128xf32> to vector<32x128xf32>
    %146 = arith.addf %142, %145 : vector<32x128xf32>
    %cst_60 = arith.constant 0.000000e+00 : f32
    %147 = vector.broadcast %cst_60 : f32 to vector<32x128xf32>
    %148 = arith.maximumf %146, %147 : vector<32x128xf32>
    %149 = arith.truncf %148 : vector<32x128xf32> to vector<32x128xbf16>
    %c0_61 = arith.constant 0 : index
    %c0_62 = arith.constant 0 : index
    %c0_63 = arith.constant 0 : index
    %150 = vector.load %arg13[%c0_61, %c0_62, %c0_63] : memref<1x128x32xbf16, #tpu.memory_space<vmem>>, vector<1x128x32xbf16>
    %151 = vector.shape_cast %150 : vector<1x128x32xbf16> to vector<128x32xbf16>
    %cst_64 = arith.constant dense<0.000000e+00> : vector<32x32xf32>
    %152 = tpu.matmul %149, %151, %cst_64 {dimension_numbers = #tpu.dot_dimension_numbers<[1], [0], [0], [1], [0, 0, 1, 1], [], []>} : vector<32x128xbf16>, vector<128x32xbf16>, vector<32x32xf32> -> vector<32x32xf32>
    %153 = arith.addf %112, %152 : vector<32x32xf32>
    %c0_65 = arith.constant 0 : index
    %c0_66 = arith.constant 0 : index
    %c0_67 = arith.constant 0 : index
    %154 = vector.load %arg14[%c0_65, %c0_66, %c0_67] : memref<1x1x32xf32, #tpu.memory_space<vmem>>, vector<1x1x32xf32>
    %155 = vector.shape_cast %154 : vector<1x1x32xf32> to vector<1x32xf32>
    %156 = vector.broadcast %155 : vector<1x32xf32> to vector<32x32xf32>
    %157 = arith.addf %153, %156 : vector<32x32xf32>
    %c0_68 = arith.constant 0 : index
    %c0_69 = arith.constant 0 : index
    %158 = vector.load %arg18[%c0_68, %c0_69] : memref<32x32xf32, #tpu.memory_space<vmem>>, vector<32x32xf32>
    tpu.vector_store %arg18[%c0_68, %c0_69], %157 {strides = array<i32>} : memref<32x32xf32, #tpu.memory_space<vmem>>, vector<32x32xf32>,
    %c1_i32 = arith.constant 1 : i32
    %159 = arith.cmpi eq, %arg1, %c1_i32 : i32
    %160 = arith.extui %159 : i1 to i32
    %c0_i32_70 = arith.constant 0 : i32
    %161 = arith.cmpi ne, %160, %c0_i32_70 : i32
    scf.if %161 {
      %c0_71 = arith.constant 0 : index
      %c0_72 = arith.constant 0 : index
      %162 = vector.load %arg15[%c0_71, %c0_72] : memref<1x32xf32, #tpu.memory_space<vmem>>, vector<1x32xf32>
      %c0_73 = arith.constant 0 : index
      %c0_74 = arith.constant 0 : index
      %163 = vector.load %arg16[%c0_73, %c0_74] : memref<1x32xf32, #tpu.memory_space<vmem>>, vector<1x32xf32>
      %cst_75 = arith.constant dense<0.000000e+00> : vector<32xf32>
      %164 = vector.multi_reduction <add>, %157, %cst_75 [1] : vector<32x32xf32> to vector<32xf32>
      %165 = vector.shape_cast %164 : vector<32xf32> to vector<32x1xf32>
      %cst_76 = arith.constant 3.200000e+01 : f32
      %166 = vector.broadcast %cst_76 : f32 to vector<32x1xf32>
      %167 = arith.divf %165, %166 : vector<32x1xf32>
      %168 = vector.broadcast %167 : vector<32x1xf32> to vector<32x32xf32>
      %169 = arith.subf %157, %168 : vector<32x32xf32>
      %170 = arith.mulf %169, %169 : vector<32x32xf32>
      %cst_77 = arith.constant dense<0.000000e+00> : vector<32xf32>
      %171 = vector.multi_reduction <add>, %170, %cst_77 [1] : vector<32x32xf32> to vector<32xf32>
      %172 = vector.shape_cast %171 : vector<32xf32> to vector<32x1xf32>
      %cst_78 = arith.constant 3.200000e+01 : f32
      %173 = vector.broadcast %cst_78 : f32 to vector<32x1xf32>
      %174 = arith.divf %172, %173 : vector<32x1xf32>
      %175 = vector.broadcast %167 : vector<32x1xf32> to vector<32x32xf32>
      %176 = arith.subf %157, %175 : vector<32x32xf32>
      %cst_79 = arith.constant 9.99999974E-6 : f32
      %177 = vector.broadcast %cst_79 : f32 to vector<32x1xf32>
      %178 = arith.addf %174, %177 : vector<32x1xf32>
      %179 = math.rsqrt %178 : vector<32x1xf32>
      %180 = vector.broadcast %179 : vector<32x1xf32> to vector<32x32xf32>
      %181 = arith.mulf %176, %180 : vector<32x32xf32>
      %182 = vector.broadcast %162 : vector<1x32xf32> to vector<32x32xf32>
      %183 = arith.mulf %181, %182 : vector<32x32xf32>
      %184 = vector.broadcast %163 : vector<1x32xf32> to vector<32x32xf32>
      %185 = arith.addf %183, %184 : vector<32x32xf32>
      %c0_80 = arith.constant 0 : index
      %c0_81 = arith.constant 0 : index
      %c0_82 = arith.constant 0 : index
      %186 = vector.load %arg17[%c0_80, %c0_81, %c0_82] : memref<1x32x32xf32, #tpu.memory_space<vmem>>, vector<1x32x32xf32>
      %187 = vector.shape_cast %186 : vector<1x32x32xf32> to vector<32x32xf32>
      %188 = vector.shape_cast %185 : vector<32x32xf32> to vector<1x32x32xf32>
      tpu.vector_store %arg17[%c0_80, %c0_81, %c0_82], %188 {strides = array<i32>} : memref<1x32x32xf32, #tpu.memory_space<vmem>>, vector<1x32x32xf32>,
    } else {
    }
    return
  }
  func.func @transform_0(%arg0: i32, %arg1: i32) -> (i32, i32, i32) {
    %c0_i32 = arith.constant 0 : i32
    %c0_i32_0 = arith.constant 0 : i32
    %c0_i32_1 = arith.constant 0 : i32
    return %arg0, %c0_i32, %c0_i32_0 : i32, i32, i32
  }
  func.func @transform_1(%arg0: i32, %arg1: i32) -> (i32, i32, i32) {
    %c0_i32 = arith.constant 0 : i32
    %c0_i32_0 = arith.constant 0 : i32
    %c0_i32_1 = arith.constant 0 : i32
    return %arg1, %c0_i32, %c0_i32_0 : i32, i32, i32
  }
  func.func @transform_2(%arg0: i32, %arg1: i32) -> (i32, i32, i32) {
    %c0_i32 = arith.constant 0 : i32
    %c0_i32_0 = arith.constant 0 : i32
    %c0_i32_1 = arith.constant 0 : i32
    return %arg1, %c0_i32, %c0_i32_0 : i32, i32, i32
  }
  func.func @transform_3(%arg0: i32, %arg1: i32) -> (i32, i32, i32) {
    %c0_i32 = arith.constant 0 : i32
    %c0_i32_0 = arith.constant 0 : i32
    %c0_i32_1 = arith.constant 0 : i32
    return %arg1, %c0_i32, %c0_i32_0 : i32, i32, i32
  }
  func.func @transform_4(%arg0: i32, %arg1: i32) -> (i32, i32, i32) {
    %c0_i32 = arith.constant 0 : i32
    %c0_i32_0 = arith.constant 0 : i32
    %c0_i32_1 = arith.constant 0 : i32
    return %arg1, %c0_i32, %c0_i32_0 : i32, i32, i32
  }
  func.func @transform_5(%arg0: i32, %arg1: i32) -> (i32, i32, i32) {
    %c0_i32 = arith.constant 0 : i32
    %c0_i32_0 = arith.constant 0 : i32
    %c0_i32_1 = arith.constant 0 : i32
    return %arg1, %c0_i32, %c0_i32_0 : i32, i32, i32
  }
  func.func @transform_6(%arg0: i32, %arg1: i32) -> (i32, i32, i32) {
    %c0_i32 = arith.constant 0 : i32
    %c0_i32_0 = arith.constant 0 : i32
    %c0_i32_1 = arith.constant 0 : i32
    return %arg1, %c0_i32, %c0_i32_0 : i32, i32, i32
  }
  func.func @transform_7(%arg0: i32, %arg1: i32) -> (i32, i32, i32) {
    %c0_i32 = arith.constant 0 : i32
    %c0_i32_0 = arith.constant 0 : i32
    %c0_i32_1 = arith.constant 0 : i32
    return %arg1, %c0_i32, %c0_i32_0 : i32, i32, i32
  }
  func.func @transform_8(%arg0: i32, %arg1: i32) -> (i32, i32, i32) {
    %c0_i32 = arith.constant 0 : i32
    %c0_i32_0 = arith.constant 0 : i32
    %c0_i32_1 = arith.constant 0 : i32
    return %arg1, %c0_i32, %c0_i32_0 : i32, i32, i32
  }
  func.func @transform_9(%arg0: i32, %arg1: i32) -> (i32, i32, i32) {
    %c0_i32 = arith.constant 0 : i32
    %c0_i32_0 = arith.constant 0 : i32
    %c0_i32_1 = arith.constant 0 : i32
    return %arg1, %c0_i32, %c0_i32_0 : i32, i32, i32
  }
  func.func @transform_10(%arg0: i32, %arg1: i32) -> (i32, i32, i32) {
    %c0_i32 = arith.constant 0 : i32
    %c0_i32_0 = arith.constant 0 : i32
    %c0_i32_1 = arith.constant 0 : i32
    return %arg1, %c0_i32, %c0_i32_0 : i32, i32, i32
  }
  func.func @transform_11(%arg0: i32, %arg1: i32) -> (i32, i32, i32) {
    %c0_i32 = arith.constant 0 : i32
    %c0_i32_0 = arith.constant 0 : i32
    %c0_i32_1 = arith.constant 0 : i32
    return %arg1, %c0_i32, %c0_i32_0 : i32, i32, i32
  }
  func.func @transform_12(%arg0: i32, %arg1: i32) -> (i32, i32, i32) {
    %c0_i32 = arith.constant 0 : i32
    %c0_i32_0 = arith.constant 0 : i32
    %c0_i32_1 = arith.constant 0 : i32
    return %arg1, %c0_i32, %c0_i32_0 : i32, i32, i32
  }
  func.func @transform_13(%arg0: i32, %arg1: i32) -> (i32, i32) {
    %c0_i32 = arith.constant 0 : i32
    %c0_i32_0 = arith.constant 0 : i32
    %c0_i32_1 = arith.constant 0 : i32
    return %c0_i32, %c0_i32_0 : i32, i32
  }
  func.func @transform_14(%arg0: i32, %arg1: i32) -> (i32, i32) {
    %c0_i32 = arith.constant 0 : i32
    %c0_i32_0 = arith.constant 0 : i32
    %c0_i32_1 = arith.constant 0 : i32
    return %c0_i32, %c0_i32_0 : i32, i32
  }
  func.func @transform_15(%arg0: i32, %arg1: i32) -> (i32, i32, i32) {
    %c0_i32 = arith.constant 0 : i32
    %c0_i32_0 = arith.constant 0 : i32
    %c0_i32_1 = arith.constant 0 : i32
    return %arg0, %c0_i32, %c0_i32_0 : i32, i32, i32
  }
}

</mosaic_0001>

<bundles_post_ra>
// kernel: tpu_custom_call.1
= control target key start
LH: loop header
LB: loop body
LE: loop exit
PB: predicated region body
PF: predicated region fallthrough
CT: control target
= control target key end

     0   :  { %s3609_s0 = inlined_call_operand.vmem [shape: f32[2,32,32], index: 0, kind: input, shape index: {}]   ;;  %s3610_s1 = inlined_call_operand.hbm [shape: f32[2,1,32], index: 1, kind: input, shape index: {}]   ;;  %s3611_s2 = inlined_call_operand.vmem [shape: f32[2,1,32], index: 2, kind: input, shape index: {}]   ;;  %s3612_s3 = inlined_call_operand.vmem [shape: bf16[2,32,96], index: 3, kind: input, shape index: {}]   ;;  %s3613_s4 = inlined_call_operand.vmem [shape: f32[2,1,96], index: 4, kind: input, shape index: {}]   ;;  %s3614_s5 = inlined_call_operand.vmem [shape: bf16[2,32,32], index: 5, kind: input, shape index: {}]   ;;  %s3615_s6 = inlined_call_operand.vmem [shape: f32[2,1,32], index: 6, kind: input, shape index: {}]   ;;  %s3616_s7 = inlined_call_operand.vmem [shape: f32[2,1,32], index: 7, kind: input, shape index: {}]   ;;  %s3617_s8 = inlined_call_operand.vmem [shape: f32[2,1,32], index: 8, kind: input, shape index: {}]   ;;  %s3618_s9 = inlined_call_operand.vmem [shape: bf16[2,32,128], index: 9, kind: input, shape index: {}]   ;;  %s3619_s10 = inlined_call_operand.vmem [shape: f32[2,1,128], index: 10, kind: input, shape index: {}]   ;;  %s3620_s11 = inlined_call_operand.vmem [shape: bf16[2,128,32], index: 11, kind: input, shape index: {}]   ;;  %s3621_s12 = inlined_call_operand.vmem [shape: f32[2,1,32], index: 12, kind: input, shape index: {}]   ;;  %s3622_s13 = inlined_call_operand.vmem [shape: f32[1,32], index: 13, kind: input, shape index: {}]   ;;  %s3623_s14 = inlined_call_operand.vmem [shape: f32[1,32], index: 14, kind: input, shape index: {}]   ;;  %s3624_s15 = inlined_call_operand.hbm [shape: f32[2,32,32], index: 15, kind: output, shape index: {}]  }
   0x1   :  { %3642 = sst [smem:[#allocation24_spill]] %s3609_s0 }
   0x2   :  { %3643 = sst [smem:[#allocation25_spill]] %s3610_s1 }
   0x3   :  { %3644 = sst [smem:[#allocation26_spill]] %s3612_s3 }
   0x4   :  { %3645 = sst [smem:[#allocation27_spill]] %s3614_s5 }
   0x5   :  { %3646 = sst [smem:[#allocation28_spill]] %s3615_s6 }
   0x6   :  { %3647 = sst [smem:[#allocation29_spill]] %s3618_s9 }
   0x7   :  { %3648 = sst [smem:[#allocation30_spill]] %s3619_s10 }
   0x8   :  { %3649 = sst [smem:[#allocation31_spill]] %s3620_s11 }
   0x9   :  { %3650 = sst [smem:[#allocation32_spill]] %s3621_s12 }
   0xa   :  { %3651 = sst [smem:[#allocation33_spill]] %s3622_s13 }
   0xb   :  { %3652 = sst [smem:[#allocation34_spill]] %s3623_s14 }
   0xc   :  { %3653 = sst [smem:[#allocation35_spill]] %s3624_s15 }
   0xd   :  { %20 = vsyncpa [#allocation4], 0 }
   0xe   :  { %22 = vsyncpa [#allocation4 + $0x1], 0 }
   0xf   :  { %23 = vsyncpa [#allocation5], 0 }
  0x10   :  { %25 = vsyncpa [#allocation5 + $0x1], 0  ;;  %s3084_s18 = smov 0   ;;  %s3086_s19 = smov 0  }
  0x11   :  { %s3088_s20 = smov 0   ;;  %s3090_s21 = smov 0  }
  0x12   :  { %s3092_s22 = smov 0   ;;  %s3094_s23 = smov 0  }
  0x13   :  { %s3096_s24 = smov 0   ;;  %s3098_s25 = smov 0  }
  0x14   :  { %s3100_s26 = smov 0   ;;  %s3102_s27 = smov 0  }
  0x15   :  { %s3104_s28 = smov 0  }
  0x16 LB: > { %3654 = sst [smem:[#allocation9_spill]] %s2945_s18  ;;  %s2338_s29 = sadd.s32 4294967295, %s2985_s28   ;;  %s2985_s28 = sphi %s3104_s28, %s31_s28   ;;  %s2981_s27 = sphi %s3102_s27, %s3711_s27   ;;  %s2977_s26 = sphi %s3100_s26, %s3710_s26   ;;  %s2973_s25 = sphi %s3098_s25, %s3709_s25   ;;  %s2969_s24 = sphi %s3096_s24, %s3708_s24   ;;  %s2965_s23 = sphi %s3094_s23, %s3707_s23   ;;  %s2961_s22 = sphi %s3092_s22, %s3706_s22   ;;  %s2957_s21 = sphi %s3090_s21, %s3705_s21   ;;  %s2953_s20 = sphi %s3088_s20, %s3704_s20   ;;  %s2949_s19 = sphi %s3086_s19, %s3703_s19   ;;  %s2945_s18 = sphi %s3084_s18, %s3702_s18  }
  0x17   : > { %3655 = sst [smem:[#allocation10_spill]] %s2949_s19  ;;  %s2339_s30 = sadd.s32 4294967294, %s2985_s28  }
  0x18   : > { %3656 = sst [smem:[#allocation11_spill]] %s2953_s20  ;;  %s40_s16 = sadd.s32 1, %s2977_s26 }
  0x19   : > { %3657 = sst [smem:[#allocation12_spill]] %s2961_s22  ;;  %s43_s17 = sadd.s32 1, %s2981_s27 }
  0x1a   : > { %3658 = sst [smem:[#allocation13_spill]] %s2965_s23  ;;  %p41_p0 = scmp.ge.s32.totalorder %s40_s16, 2 }
  0x1b   : > { %3659 = sst [smem:[#allocation14_spill]] %s2973_s25  ;;  %s76_s15 = sadd.s32 1, %s2965_s23 }
  0x1c   : > { %3660 = sst [smem:[#allocation15_spill]] %s2977_s26  ;;  %p83_p1 = scmp.ne.s32.totalorder %s2965_s23, %s2961_s22 }
  0x1d   : > { %3661 = sst [smem:[#allocation16_spill]] %s2981_s27  ;;  %p84_p2 = scmp.eq.s32.totalorder %s2985_s28, 0 }
  0x1e   : > { %3662 = sst [smem:[#allocation17_spill]] %s2985_s28  ;;  %s3713_s16 = smov (%p41_p0, %s40_s16), 0 }
  0x1f   : > { %3663 = sst [smem:[#allocation18_spill]] %s3713_s16  ;;  %s3715_s17 = smov (!%p41_p0, %s43_s17), %s2981_s27 }
  0x20   : > { %s73_s14 = ssub.s32 %s2977_s26, %s3713_s16  ;;  %p3150_p3 = por %p84_p2, %p83_p1 }
  0x21   : > { %p45_p4 = scmp.ge.s32.totalorder %s3715_s17, 2  ;;  %p74_p5 = scmp.eq.s32.totalorder %s73_s14, 0 }
  0x22   : > { %p89_p6 = scmp.ne.s32.totalorder %s2961_s22, %s2957_s21  ;;  %p90_p7 = scmp.eq.s32.totalorder %s2338_s29, 0 }
  0x23   : > { %s3717_s17 = smov (%p45_p4, %s3715_s17), 0  ;;  %s430_s10 = sadd.s32 1, %s2953_s20 }
  0x24   : > { %3665 = sst [smem:[#allocation19_spill]] %s3717_s17  ;;  %p3160_p8 = por %p90_p7, %p89_p6 }
  0x25   : > { %s3158_s12 = scalar_select %p74_p5, %s2965_s23, %s76_s15  }
  0x26   : > { %s427_s11 = ssub.s32 %s2981_s27, %s3717_s17  ;;  %p440_p10 = scmp.ne.s32.totalorder %s2953_s20, %s2949_s19 }
  0x27   : > { %3666 = sst [smem:[#allocation20_spill]] %s3158_s12  ;;  %p428_p9 = scmp.eq.s32.totalorder %s427_s11, 0 }
  0x28   : > { %p441_p11 = scmp.eq.s32.totalorder %s2338_s29, 3  ;;  %p446_p13 = scmp.ne.s32.totalorder %s2949_s19, %s2945_s18 }
  0x29   : > { %s3170_s14 = scalar_select %p428_p9, %s2953_s20, %s430_s10  }
  0x2a   : > { %p3172_p12 = por %p441_p11, %p440_p10  ;;  %p447_p0 = scmp.eq.s32.totalorder %s2339_s30, 3 }
  0x2b   : > { %3668 = sst [smem:[#allocation21_spill]] %s3170_s14  ;;  %p2596_p1 = scmp.lt.s32.totalorder %s2985_s28, 4 }
  0x2c   : > { %s3669_s21 = scalar_select %p3172_p12, 1, 0 }
  0x2d   : > { %s481_s15 = sand.u32 1, %s2965_s23   ;;  %p3180_p2 = por %p447_p0, %p446_p13 }
  0x2e   : > { %3670 = sst [smem:[#allocation22_spill]] %s3669_s21  ;;  %s2342_s11 = sshll.u32 %s2977_s26, 4 }
  0x2f   : > { %s3671_s12 = scalar_select %p3180_p2, 1, 0 }
  0x30   : > { %s3673_s1 = sld [smem:[#allocation25_spill]]  ;;  %s484_s29 = scalar_lea.vmem [#allocation3], %s481_s15 }
  0x31   : > { %3672 = sst [smem:[#allocation23_spill]] %s3671_s12  ;;  %s491_s10 = sshll.u32 %s484_s29, 4  ;;  %s492_s10 = int_to_ptr.vmem [resolvable:$true] %s491_s10 }
  0x32   : > { %p3190_p4 = pnand %p2596_p1, %p3150_p3  ;;  %p2343_p5 = scmp.ge.s32.totalorder %s2985_s28, 1 }
  0x33   : > { %p570_p6 = scmp.lt.s32.totalorder %s2985_s28, 5  ;;  %s482_s30 = scalar_lea.sflag [#allocation4], %s481_s15 }
  0x34   : > { %p2839_p7 = pneg %p3190_p4  ;;  %s2850_s23 = scalar_lea.vmem %s492_s10, 16 }
  0x35   : > { %p2851_p9 = scmp.ne.s32.totalorder %s492_s10, %s2850_s23  ;;  %s2987_s27 = smov [#allocation3]  }
  0x36   : > { %s489_s9 = scalar_lea.hbm %s3673_s1, %s2342_s11  ;;  %s2855_s17 = sshll.u32 %s2987_s27, 4  ;;  %s2856_s17 = int_to_ptr.vmem [resolvable:$false] %s2855_s17 }
  0x37   : > { %p2853_p10 = pnand %p2851_p9, %p2839_p7  ;;  %s2857_s11 = scalar_lea.vmem %s2856_s17, 32 }
  0x38   : > { %p2858_p13 = scmp.lt.s32.totalorder %s492_s10, %s2856_s17  ;;  %p2859_p0 = scmp.lt.s32.totalorder %s2857_s11, %s2850_s23 }
  0x39   : > { %p2854_p11 = pneg %p2853_p10 }
  0x3a   : > { %p2860_p3 = por %p2859_p0, %p2858_p13 }
  0x3c   : > { %p2861_p1 = pnand %p2860_p3, %p2854_p11 }
  0x3e   : > { %2864 = shalt.err (!%p2861_p1)
}
  0x3f   : > { %2591 = dma.hbm_to_vmem [thread:$0]  (!%p3190_p4), %s489_s9, 16, %s492_s10, %s482_s30  }
  0x40   : > { %p571_p2 = pnand %p2343_p5, %p570_p6 }
  0x41   : > { %s576_s13 = sand.u32 (!%p571_p2), 1, %s2961_s22  }
  0x42   : > { %574 = sbr.rel (%p571_p2) target bundleno = 4478 (0x117e), region = 80  ;;  %s577_s15 = scalar_lea.sflag (!%p571_p2), [#allocation4], %s576_s13 }
  0x43   : > { %s3205_s29 = scalar_lea.vmem (!%p571_p2), [#allocation3], %s576_s13 }
  0x47   : > { %2936 = dma.done.wait (%p3160_p8), %s577_s15, 16  }
  0x48   : > { %2938 = vsyncadd (%p3160_p8), %s577_s15, 4294967280  ;;  %s3630_s9 = sand.u32 1, %s2949_s19   ;;  %p671_p4 = scmp.lt.s32.totalorder %s2973_s25, 1 }
  0x49   : > { %s2344_s23 = sshll.u32 %s3630_s9, 5  ;;  %p676_p2 = scmp.lt.s32.totalorder %s2969_s24, 1 }
  0x4a   : > { %s672_s14 = scalar_select %p671_p4, %s2973_s25, 1 }
  0x4b   : > { %s3218_s10 = scalar_select %p676_p2, %s2969_s24, 1 }
  0x4c   : > { %s2408_s16 = sshll.u32 %s672_s14, 5  ;;  %s3675_s0 = sld [smem:[#allocation24_spill]] }
  0x4d   : > { %s2409_s9 = sshll.u32 %s3218_s10, 4  ;;  %s3676_s3 = sld [smem:[#allocation26_spill]] }
  0x4e   : > { %s3677_s5 = sld [smem:[#allocation27_spill]]  ;;  %s700_s22 = scalar_lea.vmem %s3617_s8, %s3218_s10 }
  0x4f   : > { %s2412_s25 = sshll.u32 %s3218_s10, 6  ;;  %s3681_s27 = sld [smem:[#allocation31_spill]] }
  0x50   : > { %s3682_s15 = sld [smem:[#allocation32_spill]]  ;;  %s3273_s26 = scalar_lea.vmem [#allocation6], %s2344_s23 }
  0x51   : > { %p2355_p8 = scmp.ne.s32.totalorder %s2969_s24, 0 }
  0x52   : > { %s675_s17 = scalar_lea.vmem %s3675_s0, %s2408_s16  ;;  %s3679_s0 = sld [smem:[#allocation29_spill]] }
  0x53   : > { %s3235_s18 = scalar_lea.vmem %s3676_s3, %s2409_s9 }
  0x54   : > { %s3240_s21 = scalar_lea.vmem %s3677_s5, %s2409_s9  ;;  %s3680_s5 = sld [smem:[#allocation30_spill]] }
  0x55   : > { %s3267_s6 = scalar_lea.vmem %s3681_s27, %s2412_s25 }
  0x56   : > { %s716_s1 = scalar_lea.vmem %s3682_s15, %s3218_s10  ;;  %721 = sbr.rel (%p2355_p8) target bundleno = 94 (0x5e), region = 88 }
  0x58   : > { %s3257_s3 = scalar_lea.vmem %s3679_s0, %s2409_s9 }
  0x5a   : > { %s708_s19 = scalar_lea.vmem %s3680_s5, %s3218_s10 }
  0x5b   : > { %v722_v0 = vld [vmem:[%s675_s17] sm:$0xff]  ;;  %vm726_vm0 = vcmask 261120   ;;  %v723_v1 = vld [vmem:[%s675_s17 + $0x8] sm:$0xff]  ;;  %v724_v2 = vld [vmem:[%s675_s17 + $0x10] sm:$0xff] }
  0x5c   : > { %727 = vst.msk [vmem:[#allocation2] sm:$0xff] %vm726_vm0, %v722_v0  ;;  %728 = vst.msk [vmem:[#allocation2 + $0x8] sm:$0xff] %vm726_vm0, %v723_v1  ;;  %v725_v3 = vld [vmem:[%s675_s17 + $0x18] sm:$0xff] }
  0x5d   : > { %729 = vst.msk [vmem:[#allocation2 + $0x10] sm:$0xff] %vm726_vm0, %v724_v2  ;;  %730 = vst.msk [vmem:[#allocation2 + $0x18] sm:$0xff] %vm726_vm0, %v725_v3 }
  0x5e PF: > { %vm737_vm1 = vcmask 261120   ;;  %v2731_v32 = vld [vmem:[%s3235_s18 + $0x8] sm:$0xff]   ;;  %v2732_v33 = vld [vmem:[%s3235_s18] sm:$0xff]   ;;  %s3683_s18 = scalar_lea.vmem %s3611_s2, %s3218_s10  ;;  %s3684_s9 = scalar_lea.vmem %s3613_s4, %s3218_s10  ;;  %vm899_vm2 = vcmask 64512   ;;  %vm1648_vm3 = vcmask 130048   ;;  %vm1653_vm4 = vcmask 195584  }
  0x5f   : > { %2468 = vmatprep.subr.bf16.mxu0 %v2731_v32  ;;  %v2356_v48 = vld [vmem:[%s3205_s29] ss:$0 sm:$0xff]  ;;  %s2988_s23 = smov 96   ;;  %s2989_s17 = smov 64  }
  0x60   : > { %2469 = vmatpush3.bf16.msra.mxu0 %v2731_v32  ;;  %v2357_v53 = vld [vmem:[%s3683_s18] ss:$0 sm:$0xff]  ;;  %s2990_s15 = smov 88   ;;  %s2991_s27 = smov 120  }
  0x61   : > { %2470 = vmatprep.subr.bf16.mxu0 %v2732_v33  ;;  %v2358_v3 = vld [vmem:[%s3684_s9] ss:$0 sm:$0xff]  ;;  %s2992_s12 = smov 56   ;;  %s2993_s20 = smov 80  }
  0x62   : > { %s2994_s28 = smov 112   ;;  %s2995_s14 = smov 48  }
  0x63   : > { %v731_v4 = vld [vmem:[#allocation2] sm:$0xff]  ;;  %v732_v6 = vld [vmem:[#allocation2 + $0x8] sm:$0xff]  ;;  %s2996_s16 = smov 72   ;;  %s2997_s30 = smov 104  }
  0x64   : > { %v733_v5 = vld [vmem:[#allocation2 + $0x10] sm:$0xff]  ;;  %v738_v7 = vsel %vm737_vm1, %v731_v4, 0.0  ;;  %v734_v9 = vld [vmem:[#allocation2 + $0x18] sm:$0xff]  ;;  %v741_v10 = vsel %vm737_vm1, %v732_v6, 0.0  ;;  %2471 = vmatpush3.bf16.msra.mxu0 %v2732_v33  ;;  %s2998_s11 = smov 40   ;;  %s2999_s13 = smov 8  }
  0x65   : > { %v744_v8 = vsel %vm737_vm1, %v733_v5, 0.0  ;;  %739 = vadd.xlane.f32.xlu0 %v738_v7  ;;  %v747_v11 = vsel %vm737_vm1, %v734_v9, 0.0  ;;  %s3000_s0 = smov 16   ;;  %s3001_s5 = smov 24  }
  0x66   : > { %745 = vadd.xlane.f32.xlu1 %v744_v8  ;;  %s3685_s25 = sld [smem:[#allocation28_spill]]  ;;  %p2400_p5 = scmp.ne.s32.totalorder %s2969_s24, 1 }
  0x69   : > { %742 = vadd.xlane.f32.xlu0 %v741_v10 }
  0x6a   : > { %748 = vadd.xlane.f32.xlu1 %v747_v11 }
  0x6c   : > { %s3686_s29 = scalar_lea.vmem %s3685_s25, %s3218_s10 }
  0xee   : > { %v740_v12 = vpop.xlane.xlu0 %739 }
  0xef   : > { %v746_v13 = vpop.xlane.xlu1 %745  ;;  %v751_v14 = vmul.f32 0.03125, %v740_v12 }
  0xf0   : > { %v753_v15 = vmul.f32 0.03125, %v746_v13 }
  0xf1   : > { %v755_v16 = vsub.f32 %v731_v4, %v751_v14 }
  0xf2   : > { %v757_v17 = vsub.f32 %v733_v5, %v753_v15  ;;  %v743_v18 = vpop.xlane.xlu0 %742 }
  0xf3   : > { %v749_v19 = vpop.xlane.xlu1 %748  ;;  %v752_v20 = vmul.f32 0.03125, %v743_v18  ;;  %v759_v22 = vmul.f32 %v755_v16, %v755_v16 }
  0xf4   : > { %v754_v21 = vmul.f32 0.03125, %v749_v19  ;;  %v761_v23 = vmul.f32 %v757_v17, %v757_v17 }
  0xf5   : > { %v756_v24 = vsub.f32 %v732_v6, %v752_v20  ;;  %v763_v26 = vsel %vm737_vm1, %v759_v22, 0.0 }
  0xf6   : > { %v758_v25 = vsub.f32 %v734_v9, %v754_v21  ;;  %764 = vadd.xlane.f32.xlu0 %v763_v26  ;;  %v769_v27 = vsel %vm737_vm1, %v761_v23, 0.0 }
  0xf7   : > { %v760_v28 = vmul.f32 %v756_v24, %v756_v24 }
  0xf8   : > { %v762_v29 = vmul.f32 %v758_v25, %v758_v25 }
  0xf9   : > { %v766_v30 = vsel %vm737_vm1, %v760_v28, 0.0 }
  0xfa   : > { %770 = vadd.xlane.f32.xlu0 %v769_v27  ;;  %767 = vadd.xlane.f32.xlu1 %v766_v30  ;;  %v772_v31 = vsel %vm737_vm1, %v762_v29, 0.0 }
  0xfe   : > { %773 = vadd.xlane.f32.xlu1 %v772_v31 }
 0x17f   : > { %v765_v34 = vpop.xlane.xlu0 %764 }
 0x180   : > { %v775_v35 = vmul.f32 0.03125, %v765_v34 }
 0x182   : > { %v779_v36 = vadd.f32 1e-05, %v775_v35 }
 0x183   : > { %v768_v37 = vpop.xlane.xlu1 %767  ;;  %v771_v38 = vpop.xlane.xlu0 %770 }
 0x184   : > { %2745 = vrsqrt.f32 %v779_v36  ;;  %v776_v39 = vmul.f32 0.03125, %v768_v37  ;;  %v777_v40 = vmul.f32 0.03125, %v771_v38 }
 0x186   : > { %v780_v41 = vadd.f32 1e-05, %v776_v39  ;;  %v781_v42 = vadd.f32 1e-05, %v777_v40 }
 0x187   : > { %v774_v43 = vpop.xlane.xlu1 %773 }
 0x188   : > { %2747 = vrsqrt.f32 %v780_v41  ;;  %v778_v44 = vmul.f32 0.03125, %v774_v43 }
 0x189   : > { %2749 = vrsqrt.f32 %v781_v42 }
 0x18a   : > { %v782_v45 = vadd.f32 1e-05, %v778_v44 }
 0x18c   : > { %2751 = vrsqrt.f32 %v782_v45 }
 0x191   : > { %v2746_v46 = vpop.eup %2745 }
 0x192   : > { %v787_v47 = vmul.f32 %v2746_v46, %v755_v16 }
 0x194   : > { %v797_v52 = vmul.f32 %v2356_v48, %v787_v47 }
 0x195   : > { %v2748_v49 = vpop.eup %2747 }
 0x196   : > { %v2750_v50 = vpop.eup %2749  ;;  %v788_v51 = vmul.f32 %v2748_v49, %v756_v24  ;;  %v807_v57 = vadd.f32 %v2357_v53, %v797_v52 }
 0x197   : > { %v789_v54 = vmul.f32 %v2750_v50, %v757_v17 }
 0x198   : > { %v798_v55 = vmul.f32 %v2356_v48, %v788_v51 }
 0x199   : > { %v2752_v56 = vpop.eup %2751  ;;  %v799_v60 = vmul.f32 %v2356_v48, %v789_v54 }
 0x19a   : > { %v808_v58 = vadd.f32 %v2357_v53, %v798_v55  ;;  %v790_v59 = vmul.f32 %v2752_v56, %v758_v25 }
 0x19b   : > { %v809_v63 = vadd.f32 %v2357_v53, %v799_v60 }
 0x19c   : > { %v811_v61 = vpack.c.bf16 %v808_v58, %v807_v57  ;;  %v800_v62 = vmul.f32 %v2356_v48, %v790_v59 }
 0x19e   : > { %2472 = vmatprep.mubr.msk.bf16.mxu0 %vm737_vm1, %v811_v61  ;;  %v810_v0 = vadd.f32 %v2357_v53, %v800_v62 }
 0x1a0   : > { %v812_v1 = vpack.c.bf16 %v810_v0, %v809_v63 }
 0x1a2   : > { %2473 = vmatmul.mubr.msk.bf16.vlgmr.msra.gmra.mxu0 %vm737_vm1, %v812_v1 }
 0x262   : > { %v2474_v2 = vpop.f32.mrf.mxu0 }
 0x263   : > { %v885_v6 = vadd.f32 %v2474_v2, %v2358_v3 }
 0x264   : > { %v876_v4 = vpop.f32.mrf.mxu0 }
 0x265   : > { %v877_v9 = vadd.f32 %v2358_v3, %v876_v4 }
 0x266   : > { %v2475_v5 = vpop.f32.mrf.mxu0 }
 0x267   : > { %v888_v7 = vadd.f32 %v2475_v5, %v2358_v3 }
 0x268   : > { %v879_v8 = vpop.f32.mrf.mxu0 }
 0x269   : > { %v3299_v10 = vpack.c.bf16 %v888_v7, %v885_v6  ;;  %v880_v11 = vadd.f32 %v2358_v3, %v879_v8 }
 0x26b   : > { %v3301_v12 = vpack.c.bf16 %v880_v11, %v877_v9  ;;  %897 = vrot.lane.b32.xlu0 %v3299_v10, %s2988_s23 }
 0x26d   : > { %895 = vrot.lane.b32.xlu1 %v3301_v12, %s2988_s23  ;;  %2480 = vmatprep.mubr.msk.bf16.mxu0 %vm899_vm2, %v3301_v12  ;;  %s3687_s23 = scalar_lea.vmem %s3616_s7, %s3218_s10  ;;  %s3690_s10 = sld [smem:[#allocation33_spill]] (!%p2400_p5) }
 0x2dd   : > { %v898_v13 = vpop.permute.xlu0 %897 }
 0x2de   : > { %v910_v14 = vsel %vm899_vm2, %v898_v13, 0  ;;  %2576 = vmatprep.subr.msk.bf16.mxu0 %vm899_vm2, %v898_v13 }
 0x2df   : > { %2477 = vmatpush3.bf16.xpose.msra.mxu0 %v910_v14  ;;  %v896_v15 = vpop.permute.xlu1 %895 }
 0x2e0   : > { %2577 = vmatprep.subr.msk.bf16.mxu0 %vm899_vm2, %v896_v15  ;;  %v907_v16 = vsel %vm899_vm2, %v896_v15, 0 }
 0x2e7   : > { %2479 = vmatpush3.bf16.xpose.msra.mxu0 %v907_v16 }
 0x2ee   : > { %2481 = vmatmul.mubr.msk.bf16.vlgmr.msra.gmra.mxu0 %vm899_vm2, %v3299_v10 }
 0x3ae   : > { %v2482_v17 = vpop.f32.mrf.mxu0 }
 0x3af   : > { %v967_v24 = vsel %vm737_vm1, %v2482_v17, -inf }
 0x3b0   : > { %v946_v18 = vpop.f32.mrf.mxu0 }
 0x3b1   : > { %v961_v19 = vsel %vm737_vm1, %v946_v18, -inf }
 0x3b2   : > { %962 = vmax.xlane.f32.xlu1 %v961_v19  ;;  %v2483_v20 = vpop.f32.mrf.mxu0 }
 0x3b3   : > { %v970_v22 = vsel %vm737_vm1, %v2483_v20, -inf }
 0x3b4   : > { %v949_v21 = vpop.f32.mrf.mxu0 }
 0x3b5   : > { %v964_v23 = vsel %vm737_vm1, %v949_v21, -inf }
 0x3b6   : > { %971 = vmax.xlane.f32.xlu1 %v970_v22  ;;  %965 = vmax.xlane.f32.xlu0 %v964_v23 }
 0x3ba   : > { %968 = vmax.xlane.f32.xlu0 %v967_v24 }
 0x3c7   : > { %1007 = vrot.lane.b32.xlu1 %v3301_v12, %s2989_s17 }
 0x43b   : > { %v963_v25 = vpop.xlane.xlu1 %962 }
 0x43c   : > { %v973_v30 = vsub.f32 %v946_v18, %v963_v25 }
 0x43e   : > { %v977_v35 = vmul.f32 1.442695, %v973_v30 }
 0x43f   : > { %v972_v26 = vpop.xlane.xlu1 %971  ;;  %v966_v27 = vpop.xlane.xlu0 %965 }
 0x440   : > { %v976_v28 = vsub.f32 %v2483_v20, %v972_v26  ;;  %v974_v29 = vsub.f32 %v949_v21, %v966_v27 }
 0x442   : > { %v983_v31 = vmul.f32 1.442695, %v976_v28  ;;  %v979_v32 = vmul.f32 1.442695, %v974_v29 }
 0x443   : > { %v969_v33 = vpop.xlane.xlu0 %968  ;;  %v1008_v45 = vpop.permute.xlu1 %1007 }
 0x444   : > { %2753 = vpow2.f32 %v983_v31  ;;  %v975_v34 = vsub.f32 %v2482_v17, %v969_v33 }
 0x445   : > { %2755 = vpow2.f32 %v979_v32 }
 0x446   : > { %v981_v36 = vmul.f32 1.442695, %v975_v34 }
 0x448   : > { %2757 = vpow2.f32 %v981_v36 }
 0x449   : > { %2759 = vpow2.f32 %v977_v35 }
 0x451   : > { %v2754_v37 = vpop.eup %2753 }
 0x452   : > { %v994_v38 = vsel %vm737_vm1, %v2754_v37, 0.0  ;;  %v2756_v39 = vpop.eup %2755 }
 0x453   : > { %995 = vadd.xlane.f32.xlu1 %v994_v38  ;;  %v988_v41 = vsel %vm737_vm1, %v2756_v39, 0.0 }
 0x455   : > { %v2758_v40 = vpop.eup %2757 }
 0x456   : > { %v991_v42 = vsel %vm737_vm1, %v2758_v40, 0.0  ;;  %v2760_v43 = vpop.eup %2759 }
 0x457   : > { %989 = vadd.xlane.f32.xlu1 %v988_v41  ;;  %992 = vadd.xlane.f32.xlu0 %v991_v42  ;;  %v985_v44 = vsel %vm737_vm1, %v2760_v43, 0.0 }
 0x45b   : > { %986 = vadd.xlane.f32.xlu0 %v985_v44 }
 0x468   : > { %1074 = vrot.lane.b32.xlu1 %v3299_v10, %s2990_s15 }
 0x46c   : > { %1072 = vrot.lane.b32.xlu1 %v3301_v12, %s2990_s15 }
 0x470   : > { %1070 = vrot.lane.b32.xlu1 %v3299_v10, %s2991_s27 }
 0x471   : > { %1009 = vrot.lane.b32.xlu0 %v3299_v10, %s2989_s17 }
 0x475   : > { %1068 = vrot.lane.b32.xlu0 %v3301_v12, %s2991_s27 }
 0x4dc   : > { %v996_v46 = vpop.xlane.xlu1 %995 }
 0x4e0   : > { %v990_v47 = vpop.xlane.xlu1 %989  ;;  %v993_v48 = vpop.xlane.xlu0 %992 }
 0x4e1   : > { %2761 = vrcp.f32 %v993_v48 }
 0x4e2   : > { %2763 = vrcp.f32 %v990_v47 }
 0x4e3   : > { %2765 = vrcp.f32 %v996_v46 }
 0x4e4   : > { %v987_v49 = vpop.xlane.xlu0 %986  ;;  %v1075_v51 = vpop.permute.xlu1 %1074 }
 0x4e5   : > { %2767 = vrcp.f32 %v987_v49  ;;  %v1086_v62 = vsel %vm899_vm2, %v1075_v51, 0 }
 0x4e8   : > { %v1010_v50 = vpop.permute.xlu0 %1009  ;;  %v1073_v0 = vpop.permute.xlu1 %1072 }
 0x4e9   : > { %2484 = vmatprep.subr.bf16.mxu0 %v1010_v50  ;;  %v1083_v1 = vsel %vm899_vm2, %v1073_v0, 0 }
 0x4ea   : > { %2485 = vmatpush3.bf16.msra.mxu0 %v1010_v50 }
 0x4eb   : > { %2486 = vmatprep.subr.bf16.mxu0 %v1008_v45 }
 0x4ec   : > { %v1069_v63 = vpop.permute.xlu0 %1068  ;;  %v1071_v2 = vpop.permute.xlu1 %1070 }
 0x4ee   : > { %2487 = vmatpush3.bf16.msra.mxu0 %v1008_v45  ;;  %v2762_v52 = vpop.eup %2761 }
 0x4ef   : > { %2578 = vmatprep.subr.msk.bf16.mxu0 %vm899_vm2, %v1075_v51  ;;  %v2764_v53 = vpop.eup %2763  ;;  %v1003_v56 = vmul.f32 %v2762_v52, %v2758_v40 }
 0x4f0   : > { %v2766_v54 = vpop.eup %2765  ;;  %v1002_v58 = vmul.f32 %v2764_v53, %v2756_v39 }
 0x4f1   : > { %v1004_v59 = vmul.f32 %v2766_v54, %v2754_v37 }
 0x4f2   : > { %v2768_v55 = vpop.eup %2767 }
 0x4f3   : > { %v1001_v57 = vmul.f32 %v2768_v55, %v2760_v43  ;;  %v1006_v61 = vpack.c.bf16 %v1004_v59, %v1003_v56 }
 0x4f5   : > { %v1005_v60 = vpack.c.bf16 %v1002_v58, %v1001_v57 }
 0x4f7   : > { %2488 = vmatprep.mubr.msk.bf16.mxu0 %vm737_vm1, %v1005_v60 }
 0x4f8   : > { %2489 = vmatmul.mubr.msk.bf16.vlgmr.msra.gmra.mxu0 %vm737_vm1, %v1006_v61 }
 0x4f9   : > { %2493 = vmatpush3.bf16.xpose.msra.mxu0 %v1086_v62  ;;  %2496 = vmatprep.mubr.msk.bf16.mxu0 %vm899_vm2, %v1069_v63 }
 0x4fa   : > { %2579 = vmatprep.subr.msk.bf16.mxu0 %vm899_vm2, %v1073_v0 }
 0x501   : > { %2495 = vmatpush3.bf16.xpose.msra.mxu0 %v1083_v1 }
 0x508   : > { %2497 = vmatmul.mubr.msk.bf16.vlgmr.msra.gmra.mxu0 %vm899_vm2, %v1071_v2 }
 0x5b8   : > { %v3337_v3 = vpop.f32.mrf.mxu0 }
 0x5ba   : > { %v3339_v4 = vpop.f32.mrf.mxu0 }
 0x5bc   : > { %v3341_v5 = vpop.f32.mrf.mxu0 }
 0x5be   : > { %v3343_v6 = vpop.f32.mrf.mxu0 }
 0x5c8   : > { %v2498_v7 = vpop.f32.mrf.mxu0 }
 0x5c9   : > { %v1143_v14 = vsel %vm737_vm1, %v2498_v7, -inf }
 0x5ca   : > { %v1122_v8 = vpop.f32.mrf.mxu0 }
 0x5cb   : > { %v1137_v9 = vsel %vm737_vm1, %v1122_v8, -inf }
 0x5cc   : > { %1138 = vmax.xlane.f32.xlu0 %v1137_v9  ;;  %v2499_v11 = vpop.f32.mrf.mxu0 }
 0x5cd   : > { %v1146_v16 = vsel %vm737_vm1, %v2499_v11, -inf }
 0x5ce   : > { %v1125_v13 = vpop.f32.mrf.mxu0 }
 0x5cf   : > { %v1140_v15 = vsel %vm737_vm1, %v1125_v13, -inf }
 0x5d0   : > { %1144 = vmax.xlane.f32.xlu0 %v1143_v14  ;;  %1141 = vmax.xlane.f32.xlu1 %v1140_v15 }
 0x5d4   : > { %1147 = vmax.xlane.f32.xlu0 %v1146_v16 }
 0x5e1   : > { %1183 = vrot.lane.b32.xlu1 %v3301_v12, %s2992_s12 }
 0x655   : > { %v1139_v17 = vpop.xlane.xlu0 %1138 }
 0x656   : > { %v1149_v18 = vsub.f32 %v1122_v8, %v1139_v17 }
 0x658   : > { %v1153_v22 = vmul.f32 1.442695, %v1149_v18 }
 0x659   : > { %v1145_v19 = vpop.xlane.xlu0 %1144  ;;  %v1142_v20 = vpop.xlane.xlu1 %1141 }
 0x65a   : > { %v1151_v21 = vsub.f32 %v2498_v7, %v1145_v19  ;;  %v1150_v24 = vsub.f32 %v1125_v13, %v1142_v20 }
 0x65c   : > { %v1157_v23 = vmul.f32 1.442695, %v1151_v21  ;;  %v1155_v27 = vmul.f32 1.442695, %v1150_v24 }
 0x65d   : > { %v1148_v25 = vpop.xlane.xlu0 %1147  ;;  %v1184_v37 = vpop.permute.xlu1 %1183 }
 0x65e   : > { %2769 = vpow2.f32 %v1157_v23  ;;  %v1152_v26 = vsub.f32 %v2499_v11, %v1148_v25 }
 0x65f   : > { %2771 = vpow2.f32 %v1153_v22 }
 0x660   : > { %v1159_v28 = vmul.f32 1.442695, %v1152_v26 }
 0x662   : > { %2773 = vpow2.f32 %v1159_v28 }
 0x663   : > { %2775 = vpow2.f32 %v1155_v27 }
 0x66b   : > { %v2770_v29 = vpop.eup %2769 }
 0x66c   : > { %v1167_v30 = vsel %vm737_vm1, %v2770_v29, 0.0  ;;  %v2772_v31 = vpop.eup %2771 }
 0x66d   : > { %1168 = vadd.xlane.f32.xlu0 %v1167_v30  ;;  %v1161_v33 = vsel %vm737_vm1, %v2772_v31, 0.0 }
 0x66f   : > { %v2774_v32 = vpop.eup %2773 }
 0x670   : > { %v1170_v34 = vsel %vm737_vm1, %v2774_v32, 0.0  ;;  %v2776_v35 = vpop.eup %2775 }
 0x671   : > { %1162 = vadd.xlane.f32.xlu0 %v1161_v33  ;;  %1171 = vadd.xlane.f32.xlu1 %v1170_v34  ;;  %v1164_v36 = vsel %vm737_vm1, %v2776_v35, 0.0 }
 0x675   : > { %1165 = vadd.xlane.f32.xlu1 %v1164_v36 }
 0x686   : > { %1250 = vrot.lane.b32.xlu1 %v3299_v10, %s2993_s20 }
 0x687   : > { %1185 = vrot.lane.b32.xlu0 %v3299_v10, %s2992_s12 }
 0x68a   : > { %1248 = vrot.lane.b32.xlu1 %v3301_v12, %s2993_s20 }
 0x68b   : > { %1244 = vrot.lane.b32.xlu0 %v3301_v12, %s2994_s28 }
 0x68e   : > { %1246 = vrot.lane.b32.xlu1 %v3299_v10, %s2994_s28 }
 0x6f6   : > { %v1169_v38 = vpop.xlane.xlu0 %1168 }
 0x6fa   : > { %v1163_v39 = vpop.xlane.xlu0 %1162  ;;  %v1172_v40 = vpop.xlane.xlu1 %1171 }
 0x6fb   : > { %2777 = vrcp.f32 %v1172_v40 }
 0x6fc   : > { %2779 = vrcp.f32 %v1163_v39 }
 0x6fd   : > { %2781 = vrcp.f32 %v1169_v38 }
 0x6fe   : > { %v1186_v41 = vpop.permute.xlu0 %1185  ;;  %v1166_v42 = vpop.xlane.xlu1 %1165 }
 0x6ff   : > { %2783 = vrcp.f32 %v1166_v42  ;;  %2500 = vmatprep.subr.bf16.mxu1 %v1186_v41 }
 0x700   : > { %2501 = vmatpush3.bf16.msra.mxu1 %v1186_v41 }
 0x701   : > { %2502 = vmatprep.subr.bf16.mxu1 %v1184_v37 }
 0x702   : > { %v1251_v43 = vpop.permute.xlu1 %1250  ;;  %v1245_v54 = vpop.permute.xlu0 %1244 }
 0x703   : > { %v1262_v55 = vsel %vm899_vm2, %v1251_v43, 0 }
 0x704   : > { %2503 = vmatpush3.bf16.msra.mxu1 %v1184_v37 }
 0x705   : > { %2580 = vmatprep.subr.msk.bf16.mxu1 %vm899_vm2, %v1251_v43 }
 0x706   : > { %v1249_v56 = vpop.permute.xlu1 %1248 }
 0x707   : > { %v1259_v57 = vsel %vm899_vm2, %v1249_v56, 0 }
 0x708   : > { %v2778_v44 = vpop.eup %2777 }
 0x709   : > { %v2780_v45 = vpop.eup %2779  ;;  %v1180_v48 = vmul.f32 %v2778_v44, %v2774_v32 }
 0x70a   : > { %v2782_v46 = vpop.eup %2781  ;;  %v1177_v49 = vmul.f32 %v2780_v45, %v2772_v31  ;;  %v1247_v58 = vpop.permute.xlu1 %1246 }
 0x70b   : > { %v1179_v51 = vmul.f32 %v2782_v46, %v2770_v29 }
 0x70c   : > { %v2784_v47 = vpop.eup %2783 }
 0x70d   : > { %v1178_v50 = vmul.f32 %v2784_v47, %v2776_v35  ;;  %v1182_v53 = vpack.c.bf16 %v1180_v48, %v1179_v51 }
 0x70f   : > { %v1181_v52 = vpack.c.bf16 %v1178_v50, %v1177_v49 }
 0x711   : > { %2504 = vmatprep.mubr.msk.bf16.mxu1 %vm737_vm1, %v1181_v52 }
 0x712   : > { %2505 = vmatmul.mubr.msk.bf16.vlgmr.msra.gmra.mxu1 %vm737_vm1, %v1182_v53 }
 0x713   : > { %2509 = vmatpush3.bf16.xpose.msra.mxu1 %v1262_v55  ;;  %2512 = vmatprep.mubr.msk.bf16.mxu1 %vm899_vm2, %v1245_v54 }
 0x714   : > { %2581 = vmatprep.subr.msk.bf16.mxu1 %vm899_vm2, %v1249_v56 }
 0x71b   : > { %2511 = vmatpush3.bf16.xpose.msra.mxu1 %v1259_v57 }
 0x722   : > { %2513 = vmatmul.mubr.msk.bf16.vlgmr.msra.gmra.mxu1 %vm899_vm2, %v1247_v58 }
 0x7d2   : > { %v3369_v59 = vpop.f32.mrf.mxu1 }
 0x7d4   : > { %v3371_v60 = vpop.f32.mrf.mxu1 }
 0x7d6   : > { %v3373_v61 = vpop.f32.mrf.mxu1 }
 0x7d7   : > { %v2706_v62 = vpack.i.bf16 %v3373_v61, %v3369_v59 }
 0x7d8   : > { %v3377_v63 = vpop.f32.mrf.mxu1 }
 0x7d9   : > { %v2701_v0 = vpack.i.bf16 %v3377_v63, %v3371_v60 }
 0x7e2   : > { %v2514_v1 = vpop.f32.mrf.mxu1 }
 0x7e3   : > { %v1319_v11 = vsel %vm737_vm1, %v2514_v1, -inf }
 0x7e4   : > { %v1298_v2 = vpop.f32.mrf.mxu1 }
 0x7e5   : > { %v1313_v7 = vsel %vm737_vm1, %v1298_v2, -inf }
 0x7e6   : > { %1314 = vmax.xlane.f32.xlu0 %v1313_v7  ;;  %v2515_v8 = vpop.f32.mrf.mxu1 }
 0x7e7   : > { %v1322_v14 = vsel %vm737_vm1, %v2515_v8, -inf }
 0x7e8   : > { %v1301_v9 = vpop.f32.mrf.mxu1 }
 0x7e9   : > { %v1316_v13 = vsel %vm737_vm1, %v1301_v9, -inf }
 0x7ea   : > { %1320 = vmax.xlane.f32.xlu0 %v1319_v11  ;;  %1317 = vmax.xlane.f32.xlu1 %v1316_v13 }
 0x7ee   : > { %1323 = vmax.xlane.f32.xlu0 %v1322_v14 }
 0x7fb   : > { %1359 = vrot.lane.b32.xlu1 %v3301_v12, %s2995_s14 }
 0x86f   : > { %v1315_v15 = vpop.xlane.xlu0 %1314 }
 0x870   : > { %v1325_v16 = vsub.f32 %v1298_v2, %v1315_v15 }
 0x872   : > { %v1329_v20 = vmul.f32 1.442695, %v1325_v16 }
 0x873   : > { %v1321_v17 = vpop.xlane.xlu0 %1320  ;;  %v1318_v18 = vpop.xlane.xlu1 %1317 }
 0x874   : > { %v1327_v19 = vsub.f32 %v2514_v1, %v1321_v17  ;;  %v1326_v22 = vsub.f32 %v1301_v9, %v1318_v18 }
 0x876   : > { %v1333_v21 = vmul.f32 1.442695, %v1327_v19  ;;  %v1331_v25 = vmul.f32 1.442695, %v1326_v22 }
 0x877   : > { %v1324_v23 = vpop.xlane.xlu0 %1323  ;;  %v1360_v35 = vpop.permute.xlu1 %1359 }
 0x878   : > { %2785 = vpow2.f32 %v1333_v21  ;;  %v1328_v24 = vsub.f32 %v2515_v8, %v1324_v23 }
 0x879   : > { %2787 = vpow2.f32 %v1329_v20 }
 0x87a   : > { %v1335_v26 = vmul.f32 1.442695, %v1328_v24 }
 0x87c   : > { %2789 = vpow2.f32 %v1335_v26 }
 0x87d   : > { %2791 = vpow2.f32 %v1331_v25 }
 0x885   : > { %v2786_v27 = vpop.eup %2785 }
 0x886   : > { %v1343_v28 = vsel %vm737_vm1, %v2786_v27, 0.0  ;;  %v2788_v29 = vpop.eup %2787 }
 0x887   : > { %1344 = vadd.xlane.f32.xlu0 %v1343_v28  ;;  %v1337_v31 = vsel %vm737_vm1, %v2788_v29, 0.0 }
 0x889   : > { %v2790_v30 = vpop.eup %2789 }
 0x88a   : > { %v1346_v32 = vsel %vm737_vm1, %v2790_v30, 0.0  ;;  %v2792_v33 = vpop.eup %2791 }
 0x88b   : > { %1338 = vadd.xlane.f32.xlu0 %v1337_v31  ;;  %1347 = vadd.xlane.f32.xlu1 %v1346_v32  ;;  %v1340_v34 = vsel %vm737_vm1, %v2792_v33, 0.0 }
 0x88f   : > { %1341 = vadd.xlane.f32.xlu1 %v1340_v34 }
 0x8a0   : > { %1426 = vrot.lane.b32.xlu1 %v3299_v10, %s2996_s16 }
 0x8a1   : > { %1361 = vrot.lane.b32.xlu0 %v3299_v10, %s2995_s14 }
 0x8a4   : > { %1424 = vrot.lane.b32.xlu1 %v3301_v12, %s2996_s16  ;;  %s3691_s16 = sld [smem:[#allocation34_spill]] (!%p2400_p5) }
 0x8a5   : > { %1420 = vrot.lane.b32.xlu0 %v3301_v12, %s2997_s30 }
 0x8a8   : > { %1422 = vrot.lane.b32.xlu1 %v3299_v10, %s2997_s30 }
 0x910   : > { %v1345_v36 = vpop.xlane.xlu0 %1344 }
 0x914   : > { %v1339_v37 = vpop.xlane.xlu0 %1338  ;;  %v1348_v38 = vpop.xlane.xlu1 %1347 }
 0x915   : > { %2793 = vrcp.f32 %v1348_v38 }
 0x916   : > { %2795 = vrcp.f32 %v1339_v37 }
 0x917   : > { %2797 = vrcp.f32 %v1345_v36 }
 0x918   : > { %v1362_v39 = vpop.permute.xlu0 %1361  ;;  %v1342_v40 = vpop.xlane.xlu1 %1341 }
 0x919   : > { %2799 = vrcp.f32 %v1342_v40  ;;  %2516 = vmatprep.subr.bf16.mxu0 %v1362_v39 }
 0x91a   : > { %2517 = vmatpush3.bf16.msra.mxu0 %v1362_v39 }
 0x91b   : > { %2518 = vmatprep.subr.bf16.mxu0 %v1360_v35 }
 0x91c   : > { %v1427_v41 = vpop.permute.xlu1 %1426  ;;  %v1421_v52 = vpop.permute.xlu0 %1420 }
 0x91d   : > { %v1438_v53 = vsel %vm899_vm2, %v1427_v41, 0 }
 0x91e   : > { %2519 = vmatpush3.bf16.msra.mxu0 %v1360_v35 }
 0x91f   : > { %2582 = vmatprep.subr.msk.bf16.mxu0 %vm899_vm2, %v1427_v41 }
 0x920   : > { %v1425_v54 = vpop.permute.xlu1 %1424 }
 0x921   : > { %v1435_v55 = vsel %vm899_vm2, %v1425_v54, 0 }
 0x922   : > { %v2794_v42 = vpop.eup %2793 }
 0x923   : > { %v2796_v43 = vpop.eup %2795  ;;  %v1356_v46 = vmul.f32 %v2794_v42, %v2790_v30 }
 0x924   : > { %v2798_v44 = vpop.eup %2797  ;;  %v1353_v47 = vmul.f32 %v2796_v43, %v2788_v29  ;;  %v1423_v56 = vpop.permute.xlu1 %1422 }
 0x925   : > { %v1355_v49 = vmul.f32 %v2798_v44, %v2786_v27 }
 0x926   : > { %v2800_v45 = vpop.eup %2799 }
 0x927   : > { %v1354_v48 = vmul.f32 %v2800_v45, %v2792_v33  ;;  %v1358_v51 = vpack.c.bf16 %v1356_v46, %v1355_v49 }
 0x929   : > { %v1357_v50 = vpack.c.bf16 %v1354_v48, %v1353_v47  ;;  %v2733_v47 = vld [vmem:[%s3240_s21 + $0x8] sm:$0xff]   ;;  %v2734_v48 = vld [vmem:[%s3240_s21] sm:$0xff]  }
 0x92b   : > { %2520 = vmatprep.mubr.msk.bf16.mxu0 %vm737_vm1, %v1357_v50 }
 0x92c   : > { %2521 = vmatmul.mubr.msk.bf16.vlgmr.msra.gmra.mxu0 %vm737_vm1, %v1358_v51 }
 0x92d   : > { %2525 = vmatpush3.bf16.xpose.msra.mxu0 %v1438_v53  ;;  %2528 = vmatprep.mubr.msk.bf16.mxu0 %vm899_vm2, %v1421_v52 }
 0x92e   : > { %2583 = vmatprep.subr.msk.bf16.mxu0 %vm899_vm2, %v1425_v54 }
 0x935   : > { %2527 = vmatpush3.bf16.xpose.msra.mxu0 %v1435_v55 }
 0x93c   : > { %2529 = vmatmul.mubr.msk.bf16.vlgmr.msra.gmra.mxu0 %vm899_vm2, %v1423_v56 }
 0x9ec   : > { %v2522_v57 = vpop.f32.mrf.mxu0 }
 0x9ee   : > { %v1405_v58 = vpop.f32.mrf.mxu0 }
 0x9f0   : > { %v2523_v1 = vpop.f32.mrf.mxu0 }
 0x9f1   : > { %v2716_v2 = vpack.i.bf16 %v2523_v1, %v2522_v57 }
 0x9f2   : > { %v1408_v7 = vpop.f32.mrf.mxu0 }
 0x9f3   : > { %v2711_v8 = vpack.i.bf16 %v1408_v7, %v1405_v58 }
 0x9fc   : > { %v2530_v9 = vpop.f32.mrf.mxu0 }
 0x9fd   : > { %v1495_v16 = vsel %vm737_vm1, %v2530_v9, -inf }
 0x9fe   : > { %v1474_v11 = vpop.f32.mrf.mxu0 }
 0x9ff   : > { %v1489_v13 = vsel %vm737_vm1, %v1474_v11, -inf }
 0xa00   : > { %1490 = vmax.xlane.f32.xlu0 %v1489_v13  ;;  %v2531_v14 = vpop.f32.mrf.mxu0 }
 0xa01   : > { %v1498_v18 = vsel %vm737_vm1, %v2531_v14, -inf }
 0xa02   : > { %v1477_v15 = vpop.f32.mrf.mxu0 }
 0xa03   : > { %v1492_v17 = vsel %vm737_vm1, %v1477_v15, -inf }
 0xa04   : > { %1496 = vmax.xlane.f32.xlu0 %v1495_v16  ;;  %1493 = vmax.xlane.f32.xlu1 %v1492_v17 }
 0xa08   : > { %1499 = vmax.xlane.f32.xlu0 %v1498_v18 }
 0xa89   : > { %v1491_v19 = vpop.xlane.xlu0 %1490 }
 0xa8a   : > { %v1501_v20 = vsub.f32 %v1474_v11, %v1491_v19 }
 0xa8c   : > { %v1505_v24 = vmul.f32 1.442695, %v1501_v20 }
 0xa8d   : > { %v1497_v21 = vpop.xlane.xlu0 %1496  ;;  %v1494_v22 = vpop.xlane.xlu1 %1493 }
 0xa8e   : > { %v1503_v23 = vsub.f32 %v2530_v9, %v1497_v21  ;;  %v1502_v26 = vsub.f32 %v1477_v15, %v1494_v22 }
 0xa90   : > { %v1509_v25 = vmul.f32 1.442695, %v1503_v23  ;;  %v1507_v29 = vmul.f32 1.442695, %v1502_v26 }
 0xa91   : > { %v1500_v27 = vpop.xlane.xlu0 %1499 }
 0xa92   : > { %2801 = vpow2.f32 %v1509_v25  ;;  %v1504_v28 = vsub.f32 %v2531_v14, %v1500_v27 }
 0xa93   : > { %2803 = vpow2.f32 %v1505_v24 }
 0xa94   : > { %v1511_v30 = vmul.f32 1.442695, %v1504_v28 }
 0xa96   : > { %2805 = vpow2.f32 %v1511_v30 }
 0xa97   : > { %2807 = vpow2.f32 %v1507_v29 }
 0xa9f   : > { %v2802_v31 = vpop.eup %2801 }
 0xaa0   : > { %v1519_v32 = vsel %vm737_vm1, %v2802_v31, 0.0  ;;  %v2804_v33 = vpop.eup %2803 }
 0xaa1   : > { %1520 = vadd.xlane.f32.xlu0 %v1519_v32  ;;  %v1513_v35 = vsel %vm737_vm1, %v2804_v33, 0.0 }
 0xaa3   : > { %v2806_v34 = vpop.eup %2805 }
 0xaa4   : > { %v1522_v36 = vsel %vm737_vm1, %v2806_v34, 0.0  ;;  %v2808_v37 = vpop.eup %2807 }
 0xaa5   : > { %1514 = vadd.xlane.f32.xlu0 %v1513_v35  ;;  %1523 = vadd.xlane.f32.xlu1 %v1522_v36  ;;  %v1516_v38 = vsel %vm737_vm1, %v2808_v37, 0.0  ;;  %v2826_v35 = vld [vmem:[#allocation2] sm:$0xff] }
 0xaa9   : > { %1517 = vadd.xlane.f32.xlu1 %v1516_v38 }
 0xaba   : > { %1535 = vrot.lane.b32.xlu1 %v3301_v12, %s2998_s11 }
 0xabb   : > { %1537 = vrot.lane.b32.xlu0 %v3299_v10, %s2998_s11 }
 0xabe   : > { %2702 = vrot.lane.b32.xlu1 %v2701_v0, %s2999_s13 }
 0xabf   : > { %2712 = vrot.lane.b32.xlu0 %v2711_v8, %s3000_s0 }
 0xac2   : > { %2707 = vrot.lane.b32.xlu1 %v2706_v62, %s2999_s13 }
 0xac6   : > { %2717 = vrot.lane.b32.xlu1 %v2716_v2, %s3000_s0 }
 0xb2a   : > { %v1521_v39 = vpop.xlane.xlu0 %1520 }
 0xb2e   : > { %v1515_v40 = vpop.xlane.xlu0 %1514  ;;  %v1524_v41 = vpop.xlane.xlu1 %1523 }
 0xb2f   : > { %2809 = vrcp.f32 %v1524_v41 }
 0xb30   : > { %2811 = vrcp.f32 %v1515_v40 }
 0xb31   : > { %2813 = vrcp.f32 %v1521_v39 }
 0xb32   : > { %v1538_v10 = vpop.permute.xlu0 %1537  ;;  %v1518_v12 = vpop.xlane.xlu1 %1517 }
 0xb33   : > { %2815 = vrcp.f32 %v1518_v12  ;;  %2532 = vmatprep.subr.bf16.mxu1 %v1538_v10 }
 0xb34   : > { %2533 = vmatpush3.bf16.msra.mxu1 %v1538_v10  ;;  %v2827_v10 = vld [vmem:[#allocation2 + $0x18] sm:$0xff] }
 0xb36   : > { %v1536_v60 = vpop.permute.xlu1 %1535  ;;  %v2713_v2 = vpop.permute.xlu0 %2712 }
 0xb37   : > { %2534 = vmatprep.subr.bf16.mxu1 %v1536_v60  ;;  %v2715_v18 = vunpack.i.h.bf16 %v2713_v2  ;;  %v2714_v19 = vunpack.i.l.bf16 %v2713_v2 }
 0xb38   : > { %2535 = vmatpush3.bf16.msra.mxu1 %v1536_v60  ;;  %v2828_v60 = vld [vmem:[#allocation2 + $0x8] sm:$0xff] }
 0xb39   : > { %2540 = vmatprep.subr.bf16.mxu1 %v2733_v47 }
 0xb3a   : > { %v2703_v55 = vpop.permute.xlu1 %2702 }
 0xb3b   : > { %v2705_v57 = vunpack.i.h.bf16 %v2703_v55  ;;  %v2704_v1 = vunpack.i.l.bf16 %v2703_v55 }
 0xb3c   : > { %v2810_v63 = vpop.eup %2809 }
 0xb3d   : > { %v2812_v59 = vpop.eup %2811  ;;  %v1532_v0 = vmul.f32 %v2810_v63, %v2806_v34  ;;  %v1645_v13 = vsel %vm899_vm2, %v3343_v6, %v2705_v57  ;;  %v1644_v15 = vsel %vm899_vm2, %v3339_v4, %v2704_v1 }
 0xb3e   : > { %v2814_v61 = vpop.eup %2813  ;;  %v1529_v42 = vmul.f32 %v2812_v59, %v2804_v33  ;;  %v2708_v56 = vpop.permute.xlu1 %2707  ;;  %v1649_v27 = vsel %vm1648_vm3, %v1644_v15, %v2714_v19  ;;  %v1650_v28 = vsel %vm1648_vm3, %v1645_v13, %v2715_v18  ;;  %v2825_v33 = vld [vmem:[#allocation2 + $0x10] sm:$0xff]  ;;  %v2736_v13 = vld [vmem:[%s3257_s3] sm:$0xff]   ;;  %v2741_v18 = vld [vmem:[%s3267_s6 + $0x18] sm:$0xff]  }
 0xb3f   : > { %v1531_v44 = vmul.f32 %v2814_v61, %v2802_v31  ;;  %v2710_v7 = vunpack.i.h.bf16 %v2708_v56  ;;  %v2709_v8 = vunpack.i.l.bf16 %v2708_v56  ;;  %v2738_v15 = vld [vmem:[%s3267_s6 + $0x30] sm:$0xff]  }
 0xb40   : > { %v2816_v62 = vpop.eup %2815 }
 0xb41   : > { %v1530_v43 = vmul.f32 %v2816_v62, %v2808_v37  ;;  %v1534_v46 = vpack.c.bf16 %v1532_v0, %v1531_v44  ;;  %v1647_v20 = vsel %vm899_vm2, %v3341_v5, %v2710_v7  ;;  %v1646_v21 = vsel %vm899_vm2, %v3337_v3, %v2709_v8  ;;  %v2383_v37 = vld [vmem:[%s3686_s29] ss:$0 sm:$0xff] }
 0xb42   : > { %v2718_v58 = vpop.permute.xlu1 %2717 }
 0xb43   : > { %v1533_v45 = vpack.c.bf16 %v1530_v43, %v1529_v42  ;;  %v2720_v9 = vunpack.i.h.bf16 %v2718_v58  ;;  %v2719_v11 = vunpack.i.l.bf16 %v2718_v58 }
 0xb45   : > { %2536 = vmatprep.mubr.msk.bf16.mxu1 %vm737_vm1, %v1533_v45  ;;  %v1651_v23 = vsel %vm1648_vm3, %v1646_v21, %v2719_v11  ;;  %v1652_v6 = vsel %vm1648_vm3, %v1647_v20, %v2720_v9  ;;  %v2735_v11 = vld [vmem:[%s3257_s3 + $0x8] sm:$0xff]  }
 0xb46   : > { %2537 = vmatmul.mubr.msk.bf16.vlgmr.msra.gmra.mxu1 %vm737_vm1, %v1534_v46  ;;  %2548 = vmatprep.subr.bf16.mxu0 %v2735_v11 }
 0xb47   : > { %2541 = vmatpush3.bf16.msra.mxu1 %v2733_v47  ;;  %2549 = vmatpush3.bf16.msra.mxu0 %v2735_v11 }
 0xb48   : > { %2542 = vmatprep.subr.bf16.mxu1 %v2734_v48  ;;  %2550 = vmatprep.subr.bf16.mxu0 %v2736_v13 }
 0xb4b   : > { %2543 = vmatpush3.bf16.msra.mxu1 %v2734_v48  ;;  %2551 = vmatpush3.bf16.msra.mxu0 %v2736_v13 }
 0xc06   : > { %v2538_v49 = vpop.f32.mrf.mxu1 }
 0xc08   : > { %v1581_v50 = vpop.f32.mrf.mxu1 }
 0xc0a   : > { %v2539_v51 = vpop.f32.mrf.mxu1 }
 0xc0b   : > { %v2726_v52 = vpack.i.bf16 %v2539_v51, %v2538_v49 }
 0xc0c   : > { %v1584_v53 = vpop.f32.mrf.mxu1 }
 0xc0d   : > { %v2721_v54 = vpack.i.bf16 %v1584_v53, %v1581_v50  ;;  %2727 = vrot.lane.b32.xlu1 %v2726_v52, %s3001_s5 }
 0xc0f   : > { %2722 = vrot.lane.b32.xlu0 %v2721_v54, %s3001_s5 }
 0xc7f   : > { %v2728_v14 = vpop.permute.xlu1 %2727 }
 0xc80   : > { %v2730_v16 = vunpack.i.h.bf16 %v2728_v14  ;;  %v2729_v17 = vunpack.i.l.bf16 %v2728_v14  ;;  %v2737_v14 = vld [vmem:[%s3267_s6 + $0x38] sm:$0xff]  }
 0xc81   : > { %v2723_v22 = vpop.permute.xlu0 %2722  ;;  %2556 = vmatprep.subr.bf16.mxu1 %v2737_v14 }
 0xc82   : > { %v2725_v24 = vunpack.i.h.bf16 %v2723_v22  ;;  %v2724_v25 = vunpack.i.l.bf16 %v2723_v22  ;;  %v1656_v4 = vsel %vm1653_vm4, %v1651_v23, %v2729_v17  ;;  %v1657_v26 = vsel %vm1653_vm4, %v1652_v6, %v2730_v16  ;;  %v2739_v16 = vld [vmem:[%s3267_s6 + $0x28] sm:$0xff]   ;;  %v2740_v17 = vld [vmem:[%s3267_s6 + $0x20] sm:$0xff]  }
 0xc83   : > { %v1659_v30 = vpack.c.bf16 %v1657_v26, %v1656_v4 }
 0xc84   : > { %v1654_v5 = vsel %vm1653_vm4, %v1649_v27, %v2724_v25  ;;  %v1655_v3 = vsel %vm1653_vm4, %v1650_v28, %v2725_v24 }
 0xc85   : > { %v1658_v29 = vpack.c.bf16 %v1655_v3, %v1654_v5 }
 0xc87   : > { %2544 = vmatprep.mubr.msk.bf16.mxu1 %vm737_vm1, %v1658_v29  ;;  %v2384_v29 = vld [vmem:[%s3687_s23] ss:$0 sm:$0xff] }
 0xc88   : > { %2545 = vmatmul.mubr.msk.bf16.vlgmr.msra.gmra.mxu1 %vm737_vm1, %v1659_v30 }
 0xc89   : > { %2557 = vmatpush3.bf16.msra.mxu1 %v2737_v14 }
 0xc8a   : > { %2558 = vmatprep.subr.bf16.mxu1 %v2738_v15 }
 0xc8d   : > { %2559 = vmatpush3.bf16.msra.mxu1 %v2738_v15 }
 0xc8e   : > { %2560 = vmatprep.subr.bf16.mxu1 %v2739_v16 }
 0xc91   : > { %2561 = vmatpush3.bf16.msra.mxu1 %v2739_v16 }
 0xc92   : > { %2562 = vmatprep.subr.bf16.mxu1 %v2740_v17 }
 0xc95   : > { %2563 = vmatpush3.bf16.msra.mxu1 %v2740_v17 }
 0xc96   : > { %2564 = vmatprep.subr.bf16.mxu1 %v2741_v18 }
 0xc99   : > { %2565 = vmatpush3.bf16.msra.mxu1 %v2741_v18 }
 0xd48   : > { %v2546_v31 = vpop.f32.mrf.mxu1 }
 0xd49   : > { %v1733_v34 = vadd.f32 %v2825_v33, %v2546_v31 }
 0xd4a   : > { %v1716_v32 = vpop.f32.mrf.mxu1 }
 0xd4b   : > { %v1731_v36 = vadd.f32 %v2826_v35, %v1716_v32  ;;  %v3452_v41 = vadd.f32 %v2383_v37, %v1733_v34  ;;  %v2385_v35 = vld [vmem:[%s700_s22] ss:$0 sm:$0xff] }
 0xd4c   : > { %v2547_v38 = vpop.f32.mrf.mxu1 }
 0xd4d   : > { %v3450_v39 = vadd.f32 %v2383_v37, %v1731_v36  ;;  %v1734_v12 = vadd.f32 %v2827_v10, %v2547_v38  ;;  %v1754_v0 = vsel %vm737_vm1, %v3452_v41, 0.0 }
 0xd4e   : > { %v1719_v40 = vpop.f32.mrf.mxu1 }
 0xd4f   : > { %v1732_v63 = vadd.f32 %v2828_v60, %v1719_v40  ;;  %v1748_v59 = vsel %vm737_vm1, %v3450_v39, 0.0  ;;  %v3458_v62 = vadd.f32 %v2383_v37, %v1734_v12 }
 0xd50   : > { %1749 = vadd.xlane.f32.xlu0 %v1748_v59 }
 0xd51   : > { %v3456_v61 = vadd.f32 %v2383_v37, %v1732_v63  ;;  %v1757_v43 = vsel %vm737_vm1, %v3458_v62, 0.0 }
 0xd53   : > { %v1751_v42 = vsel %vm737_vm1, %v3456_v61, 0.0 }
 0xd54   : > { %1755 = vadd.xlane.f32.xlu0 %v1754_v0  ;;  %1752 = vadd.xlane.f32.xlu1 %v1751_v42 }
 0xd58   : > { %1758 = vadd.xlane.f32.xlu0 %v1757_v43  ;;  %v2742_v43 = vld [vmem:[%s3267_s6 + $0x10] sm:$0xff]  }
 0xd59   : > { %2566 = vmatprep.subr.bf16.mxu1 %v2742_v43 }
 0xd5a   : > { %2567 = vmatpush3.bf16.msra.mxu1 %v2742_v43 }
 0xdd9   : > { %v1750_v44 = vpop.xlane.xlu0 %1749 }
 0xdda   : > { %v1760_v45 = vmul.f32 0.03125, %v1750_v44  ;;  %v2743_v44 = vld [vmem:[%s3267_s6 + $0x8] sm:$0xff]  }
 0xddb   : > { %2568 = vmatprep.subr.bf16.mxu1 %v2743_v44 }
 0xddc   : > { %v1764_v46 = vsub.f32 %v3450_v39, %v1760_v45  ;;  %2569 = vmatpush3.bf16.msra.mxu1 %v2743_v44  ;;  %v2744_v45 = vld [vmem:[%s3267_s6] sm:$0xff]  }
 0xddd   : > { %v1756_v47 = vpop.xlane.xlu0 %1755  ;;  %v1753_v48 = vpop.xlane.xlu1 %1752  ;;  %2570 = vmatprep.subr.bf16.mxu1 %v2744_v45 }
 0xdde   : > { %v1762_v49 = vmul.f32 0.03125, %v1756_v47  ;;  %v1761_v50 = vmul.f32 0.03125, %v1753_v48  ;;  %v1768_v51 = vmul.f32 %v1764_v46, %v1764_v46  ;;  %v2386_v48 = vld [vmem:[%s708_s19] ss:$0 sm:$0xff] }
 0xde0   : > { %v1766_v52 = vsub.f32 %v3452_v41, %v1762_v49  ;;  %v1765_v53 = vsub.f32 %v3456_v61, %v1761_v50  ;;  %v1772_v54 = vsel %vm737_vm1, %v1768_v51, 0.0  ;;  %2571 = vmatpush3.bf16.msra.mxu1 %v2744_v45 }
 0xde1   : > { %1773 = vadd.xlane.f32.xlu0 %v1772_v54  ;;  %v1759_v55 = vpop.xlane.xlu0 %1758 }
 0xde2   : > { %v1763_v56 = vmul.f32 0.03125, %v1759_v55  ;;  %v1770_v57 = vmul.f32 %v1766_v52, %v1766_v52  ;;  %v1769_v58 = vmul.f32 %v1765_v53, %v1765_v53 }
 0xde4   : > { %v1767_v1 = vsub.f32 %v3458_v62, %v1763_v56  ;;  %v1778_v2 = vsel %vm737_vm1, %v1770_v57, 0.0  ;;  %v1775_v7 = vsel %vm737_vm1, %v1769_v58, 0.0 }
 0xde5   : > { %1779 = vadd.xlane.f32.xlu0 %v1778_v2  ;;  %1776 = vadd.xlane.f32.xlu1 %v1775_v7 }
 0xde6   : > { %v1771_v8 = vmul.f32 %v1767_v1, %v1767_v1 }
 0xde8   : > { %v1781_v9 = vsel %vm737_vm1, %v1771_v8, 0.0  ;;  %v2399_v8 = vld [vmem:[%s716_s1] ss:$0 sm:$0xff] }
 0xde9   : > { %1782 = vadd.xlane.f32.xlu1 %v1781_v9 }
 0xe6a   : > { %v1774_v19 = vpop.xlane.xlu0 %1773 }
 0xe6b   : > { %v1784_v20 = vmul.f32 0.03125, %v1774_v19 }
 0xe6d   : > { %v1788_v21 = vadd.f32 1e-05, %v1784_v20 }
 0xe6e   : > { %v1780_v22 = vpop.xlane.xlu0 %1779  ;;  %v1777_v23 = vpop.xlane.xlu1 %1776 }
 0xe6f   : > { %2817 = vrsqrt.f32 %v1788_v21  ;;  %v1786_v6 = vmul.f32 0.03125, %v1780_v22  ;;  %v1785_v24 = vmul.f32 0.03125, %v1777_v23 }
 0xe71   : > { %v1790_v25 = vadd.f32 1e-05, %v1786_v6  ;;  %v1789_v4 = vadd.f32 1e-05, %v1785_v24 }
 0xe72   : > { %v1783_v26 = vpop.xlane.xlu1 %1782 }
 0xe73   : > { %2819 = vrsqrt.f32 %v1790_v25  ;;  %v1787_v27 = vmul.f32 0.03125, %v1783_v26 }
 0xe74   : > { %2821 = vrsqrt.f32 %v1789_v4 }
 0xe75   : > { %v1791_v28 = vadd.f32 1e-05, %v1787_v27 }
 0xe77   : > { %2823 = vrsqrt.f32 %v1791_v28 }
 0xe7c   : > { %v2818_v5 = vpop.eup %2817 }
 0xe7d   : > { %v1796_v3 = vmul.f32 %v2818_v5, %v1764_v46 }
 0xe7f   : > { %v1806_v34 = vmul.f32 %v2384_v29, %v1796_v3 }
 0xe80   : > { %v2820_v30 = vpop.eup %2819 }
 0xe81   : > { %v2822_v31 = vpop.eup %2821  ;;  %v1798_v32 = vmul.f32 %v2820_v30, %v1766_v52  ;;  %v1816_v10 = vadd.f32 %v2385_v35, %v1806_v34 }
 0xe82   : > { %v1797_v33 = vmul.f32 %v2822_v31, %v1765_v53 }
 0xe83   : > { %v1808_v40 = vmul.f32 %v2384_v29, %v1798_v32 }
 0xe84   : > { %v2824_v36 = vpop.eup %2823  ;;  %v1807_v37 = vmul.f32 %v2384_v29, %v1797_v33 }
 0xe85   : > { %v1799_v38 = vmul.f32 %v2824_v36, %v1767_v1  ;;  %v1818_v59 = vadd.f32 %v2385_v35, %v1808_v40 }
 0xe86   : > { %v1817_v12 = vadd.f32 %v2385_v35, %v1807_v37 }
 0xe87   : > { %v1809_v60 = vmul.f32 %v2384_v29, %v1799_v38 }
 0xe88   : > { %v1820_v63 = vpack.c.bf16 %v1817_v12, %v1816_v10 }
 0xe89   : > { %v1819_v0 = vadd.f32 %v2385_v35, %v1809_v60 }
 0xe8a   : > { %2552 = vmatprep.mubr.msk.bf16.mxu0 %vm737_vm1, %v1820_v63 }
 0xe8b   : > { %v1821_v42 = vpack.c.bf16 %v1819_v0, %v1818_v59 }
 0xe8d   : > { %2553 = vmatmul.mubr.msk.bf16.vlgmr.msra.gmra.mxu0 %vm737_vm1, %v1821_v42 }
 0xf4d   : > { %v2554_v46 = vpop.f32.mrf.mxu0 }
 0xf4e   : > { %v1894_v52 = vadd.f32 %v2554_v46, %v2386_v48 }
 0xf4f   : > { %v1885_v47 = vpop.f32.mrf.mxu0 }
 0xf50   : > { %v1886_v50 = vadd.f32 %v2386_v48, %v1885_v47  ;;  %v1902_v58 = vmax.f32 %v1894_v52, 0.0 }
 0xf51   : > { %v2555_v49 = vpop.f32.mrf.mxu0 }
 0xf52   : > { %v1897_v51 = vadd.f32 %v2555_v49, %v2386_v48  ;;  %v1900_v56 = vmax.f32 %v1886_v50, 0.0 }
 0xf53   : > { %v1888_v53 = vpop.f32.mrf.mxu0 }
 0xf54   : > { %v1889_v54 = vadd.f32 %v2386_v48, %v1888_v53  ;;  %v1903_v55 = vmax.f32 %v1897_v51, 0.0 }
 0xf56   : > { %v1901_v57 = vmax.f32 %v1889_v54, 0.0  ;;  %v1905_v2 = vpack.c.bf16 %v1903_v55, %v1902_v58 }
 0xf58   : > { %v1904_v1 = vpack.c.bf16 %v1901_v57, %v1900_v56 }
 0xf5a   : > { %2572 = vmatprep.mubr.bf16.mxu1 %v1904_v1 }
 0xf5b   : > { %2573 = vmatmul.mubr.bf16.vlgmr.msra.gmra.mxu1 %v1905_v2 }
0x101b   : > { %v2574_v7 = vpop.f32.mrf.mxu1 }
0x101c   : > { %v2021_v9 = vadd.f32 %v2574_v7, %v3452_v41 }
0x101d   : > { %v2004_v11 = vpop.f32.mrf.mxu1 }
0x101e   : > { %v2032_v13 = vadd.f32 %v2399_v8, %v2021_v9  ;;  %v2019_v14 = vadd.f32 %v2004_v11, %v3450_v39 }
0x101f   : > { %v2575_v15 = vpop.f32.mrf.mxu1 }
0x1020   : > { %2036 = vst.msk [vmem:[#allocation2 + $0x10] sm:$0xff] %vm737_vm1, %v2032_v13  ;;  %v2030_v16 = vadd.f32 %v2399_v8, %v2019_v14  ;;  %v2022_v17 = vadd.f32 %v2575_v15, %v3458_v62 }
0x1021   : > { %v2007_v18 = vpop.f32.mrf.mxu1 }
0x1022   : > { %2034 = vst.msk [vmem:[#allocation2] sm:$0xff] %vm737_vm1, %v2030_v16  ;;  %v2033_v19 = vadd.f32 %v2399_v8, %v2022_v17  ;;  %v2020_v20 = vadd.f32 %v2007_v18, %v3456_v61  ;;  %2041 = sbr.rel (%p2400_p5) target bundleno = 4452 (0x1164), region = 92 }
0x1024   : > { %2037 = vst.msk [vmem:[#allocation2 + $0x18] sm:$0xff] %vm737_vm1, %v2033_v19  ;;  %v2031_v21 = vadd.f32 %v2399_v8, %v2020_v20 }
0x1026   : > { %2035 = vst.msk [vmem:[#allocation2 + $0x8] sm:$0xff] %vm737_vm1, %v2031_v21 }
0x1027   : > { %v2044_v39 = vsel %vm737_vm1, %v2030_v16, 0.0  ;;  %v2050_v41 = vsel %vm737_vm1, %v2032_v13, 0.0  ;;  %v2047_v62 = vsel %vm737_vm1, %v2031_v21, 0.0  ;;  %v2053_v22 = vsel %vm737_vm1, %v2033_v19, 0.0  ;;  %v2401_v47 = vld [vmem:[%s3690_s10] ss:$0 sm:$0xff] }
0x1028   : > { %2045 = vadd.xlane.f32.xlu0 %v2044_v39  ;;  %2051 = vadd.xlane.f32.xlu1 %v2050_v41  ;;  %v2402_v49 = vld [vmem:[%s3691_s16] ss:$0 sm:$0xff] }
0x102c   : > { %2048 = vadd.xlane.f32.xlu0 %v2047_v62  ;;  %2054 = vadd.xlane.f32.xlu1 %v2053_v22 }
0x10b1   : > { %v2046_v61 = vpop.xlane.xlu0 %2045  ;;  %v2052_v23 = vpop.xlane.xlu1 %2051 }
0x10b2   : > { %v2056_v6 = vmul.f32 0.03125, %v2046_v61  ;;  %v2058_v24 = vmul.f32 0.03125, %v2052_v23 }
0x10b4   : > { %v2060_v25 = vsub.f32 %v2030_v16, %v2056_v6  ;;  %v2062_v4 = vsub.f32 %v2032_v13, %v2058_v24 }
0x10b5   : > { %v2049_v26 = vpop.xlane.xlu0 %2048  ;;  %v2055_v27 = vpop.xlane.xlu1 %2054 }
0x10b6   : > { %v2057_v28 = vmul.f32 0.03125, %v2049_v26  ;;  %v2059_v5 = vmul.f32 0.03125, %v2055_v27  ;;  %v2064_v3 = vmul.f32 %v2060_v25, %v2060_v25  ;;  %v2066_v29 = vmul.f32 %v2062_v4, %v2062_v4 }
0x10b8   : > { %v2061_v30 = vsub.f32 %v2031_v21, %v2057_v28  ;;  %v2063_v31 = vsub.f32 %v2033_v19, %v2059_v5  ;;  %v2068_v32 = vsel %vm737_vm1, %v2064_v3, 0.0  ;;  %v2074_v33 = vsel %vm737_vm1, %v2066_v29, 0.0 }
0x10b9   : > { %2069 = vadd.xlane.f32.xlu0 %v2068_v32 }
0x10ba   : > { %v2065_v34 = vmul.f32 %v2061_v30, %v2061_v30  ;;  %v2067_v35 = vmul.f32 %v2063_v31, %v2063_v31 }
0x10bc   : > { %v2071_v36 = vsel %vm737_vm1, %v2065_v34, 0.0  ;;  %v2077_v37 = vsel %vm737_vm1, %v2067_v35, 0.0 }
0x10bd   : > { %2075 = vadd.xlane.f32.xlu0 %v2074_v33  ;;  %2072 = vadd.xlane.f32.xlu1 %v2071_v36 }
0x10c1   : > { %2078 = vadd.xlane.f32.xlu1 %v2077_v37 }
0x1142   : > { %v2070_v38 = vpop.xlane.xlu0 %2069 }
0x1143   : > { %v2080_v40 = vmul.f32 0.03125, %v2070_v38 }
0x1145   : > { %v2084_v10 = vadd.f32 1e-05, %v2080_v40 }
0x1146   : > { %v2073_v12 = vpop.xlane.xlu1 %2072  ;;  %v2076_v60 = vpop.xlane.xlu0 %2075 }
0x1147   : > { %2829 = vrsqrt.f32 %v2084_v10  ;;  %v2081_v63 = vmul.f32 0.03125, %v2073_v12  ;;  %v2082_v59 = vmul.f32 0.03125, %v2076_v60 }
0x1149   : > { %v2085_v0 = vadd.f32 1e-05, %v2081_v63  ;;  %v2086_v42 = vadd.f32 1e-05, %v2082_v59 }
0x114a   : > { %v2079_v43 = vpop.xlane.xlu1 %2078 }
0x114b   : > { %2831 = vrsqrt.f32 %v2085_v0  ;;  %v2083_v44 = vmul.f32 0.03125, %v2079_v43 }
0x114c   : > { %2833 = vrsqrt.f32 %v2086_v42 }
0x114d   : > { %v2087_v45 = vadd.f32 1e-05, %v2083_v44 }
0x114f   : > { %2835 = vrsqrt.f32 %v2087_v45 }
0x1154   : > { %v2830_v46 = vpop.eup %2829 }
0x1155   : > { %v2092_v48 = vmul.f32 %v2830_v46, %v2060_v25 }
0x1157   : > { %v2102_v50 = vmul.f32 %v2401_v47, %v2092_v48 }
0x1158   : > { %v2832_v51 = vpop.eup %2831 }
0x1159   : > { %v2834_v52 = vpop.eup %2833  ;;  %v2112_v53 = vadd.f32 %v2402_v49, %v2102_v50  ;;  %v2093_v54 = vmul.f32 %v2832_v51, %v2061_v30 }
0x115a   : > { %v2094_v55 = vmul.f32 %v2834_v52, %v2062_v4 }
0x115b   : > { %2116 = vst.msk [vmem:[%s3273_s26] sm:$0xff] %vm737_vm1, %v2112_v53  ;;  %v2103_v56 = vmul.f32 %v2401_v47, %v2093_v54 }
0x115c   : > { %v2836_v57 = vpop.eup %2835  ;;  %v2104_v58 = vmul.f32 %v2401_v47, %v2094_v55 }
0x115d   : > { %v2113_v1 = vadd.f32 %v2402_v49, %v2103_v56  ;;  %v2095_v2 = vmul.f32 %v2836_v57, %v2063_v31 }
0x115e   : > { %v2114_v7 = vadd.f32 %v2402_v49, %v2104_v58 }
0x115f   : > { %2117 = vst.msk [vmem:[%s3273_s26 + $0x8] sm:$0xff] %vm737_vm1, %v2113_v1  ;;  %v2105_v8 = vmul.f32 %v2401_v47, %v2095_v2 }
0x1160   : > { %2118 = vst.msk [vmem:[%s3273_s26 + $0x10] sm:$0xff] %vm737_vm1, %v2114_v7 }
0x1161   : > { %v2115_v9 = vadd.f32 %v2402_v49, %v2105_v8 }
0x1163   : > { %2119 = vst.msk [vmem:[%s3273_s26 + $0x18] sm:$0xff] %vm737_vm1, %v2115_v9 }
0x1164 PF: > { %s3692_s30 = sld [smem:[#allocation14_spill]]  ;;  %s2134_s9 = sshll.u32 %s3273_s26, 4  ;;  %s3544_s9 = int_to_ptr.vmem [resolvable:$true] %s2134_s9 }
0x1165   : > { %s3693_s11 = sld [smem:[#allocation10_spill]]  ;;  %s2865_s15 = scalar_lea.vmem %s3544_s9, 512 }
0x1166   : > { %s3695_s25 = sld [smem:[#allocation35_spill]]  ;;  %p2866_p6 = scmp.ne.s32.totalorder %s3544_s9, %s2865_s15 }
0x1167   : > { %s3002_s22 = smov [#allocation6]  }
0x1168   : > { %p2867_p7 = pnand %p2866_p6, %p3172_p12  ;;  %s2869_s27 = sshll.u32 %s3002_s22, 4  ;;  %s2870_s27 = int_to_ptr.vmem [resolvable:$false] %s2869_s27 }
0x1169   : > { %s2871_s12 = scalar_lea.vmem %s2870_s27, 1024  ;;  %p2872_p10 = scmp.lt.s32.totalorder %s3544_s9, %s2870_s27 }
0x116a   : > { %s2413_s5 = sshll.u32 %s3692_s30, 9  ;;  %p2868_p9 = pneg %p2867_p7 }
0x116b   : > { %s3697_s23 = sand.u32 1, %s3693_s11   ;;  %p2873_p11 = scmp.lt.s32.totalorder %s2871_s12, %s2865_s15 }
0x116c   : > { %s3696_s29 = smov %s3695_s25  ;;  %s3541_s3 = scalar_lea.hbm %s3695_s25, %s2413_s5 }
0x116d   : > { %s3548_s17 = scalar_lea.sflag [#allocation5], %s3697_s23  ;;  %p2874_p13 = por %p2873_p11, %p2872_p10 }
0x116f   : > { %p2875_p0 = pnand %p2874_p13, %p2868_p9 }
0x1171   : > { %2878 = shalt.err (!%p2875_p0)
}
0x1172   : > { %s2879_s26 = scalar_lea.hbm %s3541_s3, 512  ;;  %s2883_s28 = scalar_lea.hbm %s3696_s29, 1024 }
0x1173   : > { %p2880_p3 = scmp.ne.s32.totalorder %s3541_s3, %s2879_s26  ;;  %p2884_p2 = scmp.lt.s32.totalorder %s3541_s3, %s3696_s29 }
0x1174   : > { %p2885_p8 = scmp.lt.s32.totalorder %s2883_s28, %s2879_s26 }
0x1175   : > { %p2881_p1 = pnand %p2880_p3, %p3172_p12 }
0x1176   : > { %p2886_p5 = por %p2885_p8, %p2884_p2 }
0x1177   : > { %p2882_p4 = pneg %p2881_p1 }
0x1179   : > { %p2887_p6 = pnand %p2886_p5, %p2882_p4 }
0x117b   : > { %2890 = shalt.err (!%p2887_p6)
}
0x117c   : > { %s3003_s10 = smov 128  }
0x117d   : > { %2586 = dma.vmem_to_hbm [thread:$0]  (%p3172_p12), %s3544_s9, 512, %s3541_s3, %s3548_s17, %s3003_s10, %s3003_s10, %s2999_s13  }
0x117e PF: > { %s3698_s1 = sld [smem:[#allocation17_spill]] }
0x117f   : > { %s3699_s14 = sld [smem:[#allocation9_spill]] }
0x1180   : > { %s3700_s16 = sld [smem:[#allocation23_spill]] }
0x1184   : > { %p2597_p7 = scmp.ge.s32.totalorder %s3698_s1, 2 }
0x1185   : > { %s2149_s30 = sand.u32 1, %s3699_s14  }
0x1186   : > { %p3701_p9 = scmp.ne.s32.totalorder %s3700_s16, 0  ;;  %s2150_s11 = scalar_lea.sflag [#allocation5], %s2149_s30 }
0x1188   : > { %p2593_p10 = pnand %p2597_p7, %p3701_p9 }
0x118a   : > { %p2594_p11 = pneg %p2593_p10 }
0x118c   : > { %2940 = dma.done.wait (%p2594_p11), %s2150_s11, 512  }
0x118d   : > { %2942 = vsyncadd (%p2594_p11), %s2150_s11, 4294966784  ;;  %s31_s28 = sadd.s32 1, %s3698_s1   ;;  %s3702_s18 = sld [smem:[#allocation10_spill]] }
0x118e   : > { %p28_p13 = scmp.ge.s32.totalorder %s31_s28, 6   ;;  %s3703_s19 = sld [smem:[#allocation11_spill]] }
0x118f   : > { %s3704_s20 = sld [smem:[#allocation21_spill]] }
0x1190   : > { %s3705_s21 = sld [smem:[#allocation12_spill]] }
0x1191   : > { %s3706_s22 = sld [smem:[#allocation13_spill]] }
0x1192   : > { %s3707_s23 = sld [smem:[#allocation20_spill]]  ;;  %30 = sbr.rel (!%p28_p13) target bundleno = 22 (0x16), region = 169 }
0x1193   : > { %s3708_s24 = sld [smem:[#allocation15_spill]] }
0x1194   : > { %s3709_s25 = sld [smem:[#allocation16_spill]] }
0x1195   : > { %s3710_s26 = sld [smem:[#allocation18_spill]] }
0x1196   : > { %s3711_s27 = sld [smem:[#allocation19_spill]] }
0x1197   :  { %2155 = vsyncpa [#allocation4], 1 }
0x1198   :  { %2157 = vsyncpa [#allocation4 + $0x1], 1 }
0x1199   :  { %2158 = vsyncpa [#allocation5], 1 }
0x119a   :  { %2160 = vsyncpa [#allocation5 + $0x1], 1 }

</bundles_post_ra>
